<compile_context>
chip_gen: v7x
topology: tpu7x:2x2x1
jax: 0.10.0
libtpu: 0.0.40
codegen_flags: <defaults>
</compile_context>

<pallas_src>
import functools

import jax
import jax.numpy as jnp
from jax.experimental import pallas as pl
from jax.experimental.pallas import tpu as pltpu

INPUT_SIZE = 784
HIDDEN_SIZE = 30


def _round_up(x, m):
    return (x + m - 1) // m * m


def ae_kernel(x_ref, w1_ref, b1_ref, w2_ref, b2_ref, w3_ref, b3_ref,
              w4_ref, b4_ref, o_ref):
    wdt = w1_ref.dtype                         # bf16 operands, f32 accumulation
    x = x_ref[...].astype(wdt)
    # ---- encoder ----
    h = jnp.dot(x, w1_ref[...], preferred_element_type=jnp.float32) + b1_ref[...]
    h = jnp.maximum(h, 0.0)                                   # ReLU
    h = jnp.dot(h.astype(wdt), w2_ref[...],
                preferred_element_type=jnp.float32) + b2_ref[...]
    h = jnp.maximum(h, 0.0)                                   # ReLU
    # ---- decoder ----
    h = jnp.dot(h.astype(wdt), w3_ref[...],
                preferred_element_type=jnp.float32) + b3_ref[...]
    h = jnp.maximum(h, 0.0)                                   # ReLU
    y = jnp.dot(h.astype(wdt), w4_ref[...],
                preferred_element_type=jnp.float32) + b4_ref[...]
    o_ref[...] = jnp.tanh(y)                                  # Tanh


def init_params(key, input_size=INPUT_SIZE, hidden_size=HIDDEN_SIZE):
    """Deterministic init mimicking PyTorch's default Linear init:
    U(-1/sqrt(fan_in), 1/sqrt(fan_in)) for both weight and bias."""
    dims = [(input_size, hidden_size),
            (hidden_size, hidden_size),
            (hidden_size, hidden_size),
            (hidden_size, input_size)]
    params = []
    for (fan_in, fan_out) in dims:
        key, kw, kb = jax.random.split(key, 3)
        bound = 1.0 / jnp.sqrt(float(fan_in))
        # stored as (in, out) == W.T relative to PyTorch's (out, in)
        w = jax.random.uniform(kw, (fan_in, fan_out), jnp.float32,
                               minval=-bound, maxval=bound)
        b = jax.random.uniform(kb, (fan_out,), jnp.float32,
                               minval=-bound, maxval=bound)
        params.append((w, b))
    return params


def prepare_params(params, weight_dtype=jnp.bfloat16):
    """One-time padding (hidden 30 -> 128 lanes) + bf16 cast of the weights.
    Biases stay f32 (added after the f32-accumulated matmul)."""
    (w1, b1), (w2, b2), (w3, b3), (w4, b4) = params
    H = w1.shape[1]
    Hp = _round_up(H, 128)
    dh = Hp - H
    w1p = jnp.pad(w1, ((0, 0), (0, dh))).astype(weight_dtype)   # (784, 128)
    w2p = jnp.pad(w2, ((0, dh), (0, dh))).astype(weight_dtype)  # (128, 128)
    w3p = jnp.pad(w3, ((0, dh), (0, dh))).astype(weight_dtype)  # (128, 128)
    w4p = jnp.pad(w4, ((0, dh), (0, 0))).astype(weight_dtype)   # (128, 784)
    b1p = jnp.pad(b1, (0, dh))[None, :]           # (1, 128) f32
    b2p = jnp.pad(b2, (0, dh))[None, :]           # (1, 128) f32
    b3p = jnp.pad(b3, (0, dh))[None, :]           # (1, 128) f32
    b4p = b4[None, :]                             # (1, 784) f32
    return ((w1p, b1p), (w2p, b2p), (w3p, b3p), (w4p, b4p))


def _default_tile_b():
    """Generation-aware default batch tile (VMEM: 128 MiB v5e/v6e, 64 MiB v7x)."""
    try:
        kind = jax.devices()[0].device_kind.lower()
    except Exception:
        kind = ""
    if "v6" in kind:
        return 2048        # v6e: VMEM headroom -> bigger tiles amortize step cost
    return 1024            # v7x (64 MiB VMEM), v5e, and anything else


def autoencoder_forward(x, padded_params, tile_b=None):
    if tile_b is None:
        tile_b = _default_tile_b()
    return _autoencoder_forward(x, padded_params, tile_b=int(tile_b))


@functools.partial(jax.jit, static_argnames=("tile_b",))
def _autoencoder_forward(x, padded_params, *, tile_b):
    (w1, b1), (w2, b2), (w3, b3), (w4, b4) = padded_params
    B, F = x.shape
    H = w1.shape[1]

    # Batch tile: multiple of 8 sublanes; clamp so the grid has >= 2 steps when
    # the batch allows it ("parallel" axis can then shard across v7x's two TCs).
    tile = max(8, min(tile_b, _round_up(pl.cdiv(B, 2), 8)))
    tile = _round_up(tile, 8)
    # Ragged batches: no wrapper pad/slice — Pallas masks the final partial block.
    grid = (pl.cdiv(B, tile),)

    # Explicit scoped-VMEM budget: x/out are double-buffered and lane-padded
    # (784 -> 896); weights/biases resident (double-buffered by default); plus the
    # (tile, 896) f32 pre-tanh intermediate and headroom for compiler temporaries.
    lane_f = _round_up(F, 128)
    stream = tile * lane_f * 4                       # one f32 x-or-out buffer
    w_bytes = sum(int(a.size) * a.dtype.itemsize
                  for a in (w1, b1, w2, b2, w3, b3, w4, b4))
    vmem_need = 4 * stream + 2 * stream + 2 * w_bytes
    vmem_limit = int(min(max(vmem_need + (8 << 20), 32 << 20), 64 << 20))

    cost = pl.CostEstimate(
        flops=2 * B * (F * H + H * H + H * H + H * F),
        transcendentals=B * F,                       # tanh
        bytes_accessed=2 * B * F * 4 + w_bytes,      # stream x in, out back, weights
    )

    const = lambda i: (0, 0)   # weights/biases: fetched once, resident in VMEM

    out = pl.pallas_call(
        ae_kernel,
        out_shape=jax.ShapeDtypeStruct((B, F), jnp.float32),
        grid=grid,
        in_specs=[
            pl.BlockSpec((tile, F), lambda i: (i, 0)),   # x: streamed per tile
            pl.BlockSpec(w1.shape, const),
            pl.BlockSpec(b1.shape, const),
            pl.BlockSpec(w2.shape, const),
            pl.BlockSpec(b2.shape, const),
            pl.BlockSpec(w3.shape, const),
            pl.BlockSpec(b3.shape, const),
            pl.BlockSpec(w4.shape, const),
            pl.BlockSpec(b4.shape, const),
        ],
        out_specs=pl.BlockSpec((tile, F), lambda i: (i, 0)),
        compiler_params=pltpu.CompilerParams(
            dimension_semantics=("parallel",),
            vmem_limit_bytes=vmem_limit),
        cost_estimate=cost,
    )(x, w1, b1, w2, b2, w3, b3, w4, b4)

    return out


def reference_forward(x, params):
    (w1, b1), (w2, b2), (w3, b3), (w4, b4) = params
    h = jnp.maximum(x @ w1 + b1, 0.0)
    h = jnp.maximum(h @ w2 + b2, 0.0)
    h = jnp.maximum(h @ w3 + b3, 0.0)
    return jnp.tanh(h @ w4 + b4)


if __name__ == "__main__":
    key = jax.random.PRNGKey(0)
    key, kx = jax.random.split(key)

    # batch=200 exercises both the auto-tile path (tile clamped to ~B/2 -> 2-step
    # grid with a ragged final block) and, with tile_b=64, a 4-step ragged grid.
    batch = 200
    x = jax.random.normal(kx, (batch, INPUT_SIZE), jnp.float32)

    params = init_params(key)
    padded_params = prepare_params(params)       # one-time pad + bf16 cast

    ref = reference_forward(x, params)

    out_auto = jax.block_until_ready(autoencoder_forward(x, padded_params))
    out_64 = jax.block_until_ready(autoencoder_forward(x, padded_params, tile_b=64))

    assert out_auto.shape == (batch, INPUT_SIZE)
    assert out_64.shape == (batch, INPUT_SIZE)
    # bf16 MXU operands (f32 accumulation) -> relaxed tolerance vs f32 reference.
    assert jnp.allclose(out_auto, ref, atol=2e-2, rtol=2e-2), "auto-tile mismatch"
    assert jnp.allclose(out_64, ref, atol=2e-2, rtol=2e-2), "tile=64 mismatch"

    print("KERNEL_OK")
</pallas_src>

<mosaic_0001>
module attributes {stable_mosaic.version = 11 : i64} {
  func.func @ae_kernel(%arg0: i32, %arg1: memref<104x784xf32, #tpu.memory_space<vmem>>, %arg2: memref<784x128xbf16, #tpu.memory_space<vmem>>, %arg3: memref<1x128xf32, #tpu.memory_space<vmem>>, %arg4: memref<128x128xbf16, #tpu.memory_space<vmem>>, %arg5: memref<1x128xf32, #tpu.memory_space<vmem>>, %arg6: memref<128x128xbf16, #tpu.memory_space<vmem>>, %arg7: memref<1x128xf32, #tpu.memory_space<vmem>>, %arg8: memref<128x784xbf16, #tpu.memory_space<vmem>>, %arg9: memref<1x784xf32, #tpu.memory_space<vmem>>, %arg10: memref<104x784xf32, #tpu.memory_space<vmem>>) attributes {dimension_semantics = [#tpu.dimension_semantics<parallel>], iteration_bounds = array<i64: 2>, scalar_prefetch = 0 : i64, scratch_operands = 0 : i64, tpu.core_type = #tpu.core_type<tc>, window_params = [{transform_indices = @transform_0, window_bounds = array<i64: 104, 784>}, {pipeline_mode = #tpu.pipeline_mode<synchronous>, transform_indices = @transform_1, window_bounds = array<i64: 784, 128>}, {pipeline_mode = #tpu.pipeline_mode<synchronous>, transform_indices = @transform_2, window_bounds = array<i64: 1, 128>}, {pipeline_mode = #tpu.pipeline_mode<synchronous>, transform_indices = @transform_3, window_bounds = array<i64: 128, 128>}, {pipeline_mode = #tpu.pipeline_mode<synchronous>, transform_indices = @transform_4, window_bounds = array<i64: 1, 128>}, {pipeline_mode = #tpu.pipeline_mode<synchronous>, transform_indices = @transform_5, window_bounds = array<i64: 128, 128>}, {pipeline_mode = #tpu.pipeline_mode<synchronous>, transform_indices = @transform_6, window_bounds = array<i64: 1, 128>}, {pipeline_mode = #tpu.pipeline_mode<synchronous>, transform_indices = @transform_7, window_bounds = array<i64: 128, 784>}, {pipeline_mode = #tpu.pipeline_mode<synchronous>, transform_indices = @transform_8, window_bounds = array<i64: 1, 784>}, {transform_indices = @transform_9, window_bounds = array<i64: 104, 784>}]} {
    %c0 = arith.constant 0 : index
    %c0_0 = arith.constant 0 : index
    %0 = vector.load %arg1[%c0, %c0_0] : memref<104x784xf32, #tpu.memory_space<vmem>>, vector<104x784xf32>
    %1 = arith.truncf %0 : vector<104x784xf32> to vector<104x784xbf16>
    %c0_1 = arith.constant 0 : index
    %c0_2 = arith.constant 0 : index
    %2 = vector.load %arg2[%c0_1, %c0_2] : memref<784x128xbf16, #tpu.memory_space<vmem>>, vector<784x128xbf16>
    %cst = arith.constant dense<0.000000e+00> : vector<104x128xf32>
    %3 = tpu.matmul %1, %2, %cst {dimension_numbers = #tpu.dot_dimension_numbers<[1], [0], [0], [1], [0, 0, 1, 1], [], []>} : vector<104x784xbf16>, vector<784x128xbf16>, vector<104x128xf32> -> vector<104x128xf32>
    %c0_3 = arith.constant 0 : index
    %c0_4 = arith.constant 0 : index
    %4 = vector.load %arg3[%c0_3, %c0_4] : memref<1x128xf32, #tpu.memory_space<vmem>>, vector<1x128xf32>
    %5 = vector.broadcast %4 : vector<1x128xf32> to vector<104x128xf32>
    %6 = arith.addf %3, %5 : vector<104x128xf32>
    %cst_5 = arith.constant 0.000000e+00 : f32
    %7 = vector.broadcast %cst_5 : f32 to vector<104x128xf32>
    %8 = arith.maximumf %6, %7 : vector<104x128xf32>
    %9 = arith.truncf %8 : vector<104x128xf32> to vector<104x128xbf16>
    %c0_6 = arith.constant 0 : index
    %c0_7 = arith.constant 0 : index
    %10 = vector.load %arg4[%c0_6, %c0_7] : memref<128x128xbf16, #tpu.memory_space<vmem>>, vector<128x128xbf16>
    %cst_8 = arith.constant dense<0.000000e+00> : vector<104x128xf32>
    %11 = tpu.matmul %9, %10, %cst_8 {dimension_numbers = #tpu.dot_dimension_numbers<[1], [0], [0], [1], [0, 0, 1, 1], [], []>} : vector<104x128xbf16>, vector<128x128xbf16>, vector<104x128xf32> -> vector<104x128xf32>
    %c0_9 = arith.constant 0 : index
    %c0_10 = arith.constant 0 : index
    %12 = vector.load %arg5[%c0_9, %c0_10] : memref<1x128xf32, #tpu.memory_space<vmem>>, vector<1x128xf32>
    %13 = vector.broadcast %12 : vector<1x128xf32> to vector<104x128xf32>
    %14 = arith.addf %11, %13 : vector<104x128xf32>
    %cst_11 = arith.constant 0.000000e+00 : f32
    %15 = vector.broadcast %cst_11 : f32 to vector<104x128xf32>
    %16 = arith.maximumf %14, %15 : vector<104x128xf32>
    %17 = arith.truncf %16 : vector<104x128xf32> to vector<104x128xbf16>
    %c0_12 = arith.constant 0 : index
    %c0_13 = arith.constant 0 : index
    %18 = vector.load %arg6[%c0_12, %c0_13] : memref<128x128xbf16, #tpu.memory_space<vmem>>, vector<128x128xbf16>
    %cst_14 = arith.constant dense<0.000000e+00> : vector<104x128xf32>
    %19 = tpu.matmul %17, %18, %cst_14 {dimension_numbers = #tpu.dot_dimension_numbers<[1], [0], [0], [1], [0, 0, 1, 1], [], []>} : vector<104x128xbf16>, vector<128x128xbf16>, vector<104x128xf32> -> vector<104x128xf32>
    %c0_15 = arith.constant 0 : index
    %c0_16 = arith.constant 0 : index
    %20 = vector.load %arg7[%c0_15, %c0_16] : memref<1x128xf32, #tpu.memory_space<vmem>>, vector<1x128xf32>
    %21 = vector.broadcast %20 : vector<1x128xf32> to vector<104x128xf32>
    %22 = arith.addf %19, %21 : vector<104x128xf32>
    %cst_17 = arith.constant 0.000000e+00 : f32
    %23 = vector.broadcast %cst_17 : f32 to vector<104x128xf32>
    %24 = arith.maximumf %22, %23 : vector<104x128xf32>
    %25 = arith.truncf %24 : vector<104x128xf32> to vector<104x128xbf16>
    %c0_18 = arith.constant 0 : index
    %c0_19 = arith.constant 0 : index
    %26 = vector.load %arg8[%c0_18, %c0_19] : memref<128x784xbf16, #tpu.memory_space<vmem>>, vector<128x784xbf16>
    %cst_20 = arith.constant dense<0.000000e+00> : vector<104x784xf32>
    %27 = tpu.matmul %25, %26, %cst_20 {dimension_numbers = #tpu.dot_dimension_numbers<[1], [0], [0], [1], [0, 0, 1, 1], [], []>} : vector<104x128xbf16>, vector<128x784xbf16>, vector<104x784xf32> -> vector<104x784xf32>
    %c0_21 = arith.constant 0 : index
    %c0_22 = arith.constant 0 : index
    %28 = vector.load %arg9[%c0_21, %c0_22] : memref<1x784xf32, #tpu.memory_space<vmem>>, vector<1x784xf32>
    %29 = vector.broadcast %28 : vector<1x784xf32> to vector<104x784xf32>
    %30 = arith.addf %27, %29 : vector<104x784xf32>
    %31 = math.tanh %30 : vector<104x784xf32>
    %c0_23 = arith.constant 0 : index
    %c0_24 = arith.constant 0 : index
    %32 = vector.load %arg10[%c0_23, %c0_24] : memref<104x784xf32, #tpu.memory_space<vmem>>, vector<104x784xf32>
    tpu.vector_store %arg10[%c0_23, %c0_24], %31 {strides = array<i32>} : memref<104x784xf32, #tpu.memory_space<vmem>>, vector<104x784xf32>,
    return
  }
  func.func @transform_0(%arg0: i32) -> (i32, i32) {
    %c0_i32 = arith.constant 0 : i32
    %c0_i32_0 = arith.constant 0 : i32
    return %arg0, %c0_i32 : i32, i32
  }
  func.func @transform_1(%arg0: i32) -> (i32, i32) {
    %c0_i32 = arith.constant 0 : i32
    %c0_i32_0 = arith.constant 0 : i32
    %c0_i32_1 = arith.constant 0 : i32
    return %c0_i32, %c0_i32_0 : i32, i32
  }
  func.func @transform_2(%arg0: i32) -> (i32, i32) {
    %c0_i32 = arith.constant 0 : i32
    %c0_i32_0 = arith.constant 0 : i32
    %c0_i32_1 = arith.constant 0 : i32
    return %c0_i32, %c0_i32_0 : i32, i32
  }
  func.func @transform_3(%arg0: i32) -> (i32, i32) {
    %c0_i32 = arith.constant 0 : i32
    %c0_i32_0 = arith.constant 0 : i32
    %c0_i32_1 = arith.constant 0 : i32
    return %c0_i32, %c0_i32_0 : i32, i32
  }
  func.func @transform_4(%arg0: i32) -> (i32, i32) {
    %c0_i32 = arith.constant 0 : i32
    %c0_i32_0 = arith.constant 0 : i32
    %c0_i32_1 = arith.constant 0 : i32
    return %c0_i32, %c0_i32_0 : i32, i32
  }
  func.func @transform_5(%arg0: i32) -> (i32, i32) {
    %c0_i32 = arith.constant 0 : i32
    %c0_i32_0 = arith.constant 0 : i32
    %c0_i32_1 = arith.constant 0 : i32
    return %c0_i32, %c0_i32_0 : i32, i32
  }
  func.func @transform_6(%arg0: i32) -> (i32, i32) {
    %c0_i32 = arith.constant 0 : i32
    %c0_i32_0 = arith.constant 0 : i32
    %c0_i32_1 = arith.constant 0 : i32
    return %c0_i32, %c0_i32_0 : i32, i32
  }
  func.func @transform_7(%arg0: i32) -> (i32, i32) {
    %c0_i32 = arith.constant 0 : i32
    %c0_i32_0 = arith.constant 0 : i32
    %c0_i32_1 = arith.constant 0 : i32
    return %c0_i32, %c0_i32_0 : i32, i32
  }
  func.func @transform_8(%arg0: i32) -> (i32, i32) {
    %c0_i32 = arith.constant 0 : i32
    %c0_i32_0 = arith.constant 0 : i32
    %c0_i32_1 = arith.constant 0 : i32
    return %c0_i32, %c0_i32_0 : i32, i32
  }
  func.func @transform_9(%arg0: i32) -> (i32, i32) {
    %c0_i32 = arith.constant 0 : i32
    %c0_i32_0 = arith.constant 0 : i32
    return %arg0, %c0_i32 : i32, i32
  }
}

</mosaic_0001>

<bundles_post_ra>
// kernel: _autoencoder_forward.1
= control target key start
LH: loop header
LB: loop body
LE: loop exit
PB: predicated region body
PF: predicated region fallthrough
CT: control target
= control target key end

     0   :  { %14 = vsyncpa [#allocation3], 0  ;;  %s4879_s0 = inlined_call_operand.hbm [shape: f32[200,784], index: 0, kind: input, shape index: {}]   ;;  %s4880_s1 = inlined_call_operand.vmem [shape: bf16[784,128], index: 1, kind: input, shape index: {}]   ;;  %s4881_s2 = inlined_call_operand.vmem [shape: f32[1,128], index: 2, kind: input, shape index: {}]   ;;  %s4882_s3 = inlined_call_operand.vmem [shape: bf16[128,128], index: 3, kind: input, shape index: {}]   ;;  %s4883_s4 = inlined_call_operand.vmem [shape: f32[1,128], index: 4, kind: input, shape index: {}]   ;;  %s4884_s5 = inlined_call_operand.vmem [shape: bf16[128,128], index: 5, kind: input, shape index: {}]   ;;  %s4885_s6 = inlined_call_operand.vmem [shape: f32[1,128], index: 6, kind: input, shape index: {}]   ;;  %s4886_s7 = inlined_call_operand.vmem [shape: bf16[128,784], index: 7, kind: input, shape index: {}]   ;;  %s4887_s8 = inlined_call_operand.vmem [shape: f32[1,784], index: 8, kind: input, shape index: {}]   ;;  %s4888_s9 = inlined_call_operand.hbm [shape: f32[200,784], index: 9, kind: output, shape index: {}]  }
   0x1   :  { %16 = vsyncpa [#allocation3 + $0x1], 0 }
   0x2   :  { %17 = vsyncpa [#allocation4], 0 }
   0x3   :  { %19 = vsyncpa [#allocation4 + $0x1], 0  ;;  %s3790_s30 = smov 0   ;;  %s3792_s10 = smov 0  }
   0x4   :  { %s3794_s11 = smov 0   ;;  %s3796_s12 = smov 0  }
   0x5 LB: > { %4891 = sst [smem:[#allocation8_spill]] %s3725_s11  ;;  %s3811_s13 = sadd.s32 4294967295, %s3729_s12   ;;  %s3729_s12 = sphi %s3796_s12, %s4902_s12   ;;  %s3725_s11 = sphi %s3794_s11, %s4899_s11   ;;  %s3721_s10 = sphi %s3792_s10, %s4901_s10   ;;  %s3717_s30 = sphi %s3790_s30, %s4900_s30  }
   0x6   : > { %s2720_s14 = sadd.s32 4294967294, %s3729_s12   ;;  %s3815_s15 = sadd.s32 1, %s3729_s12  }
   0x7   : > { %s32_s16 = sadd.s32 1, %s3725_s11  ;;  %s29_s17 = ssub.s32 %s3729_s12, %s3815_s15 }
   0x8   : > { %p39_p0 = scmp.ne.s32.totalorder %s3725_s11, %s3721_s10  ;;  %p30_p1 = scmp.eq.s32.totalorder %s29_s17, 0 }
   0x9   : > { %p40_p2 = scmp.eq.s32.totalorder %s3729_s12, 0  ;;  %p45_p3 = scmp.ne.s32.totalorder %s3721_s10, %s3717_s30 }
   0xa   : > { %p46_p4 = scmp.eq.s32.totalorder %s3811_s13, 0  ;;  %p237_p7 = scmp.eq.s32.totalorder %s3811_s13, 1 }
   0xb   : > { %s3827_s18 = scalar_select %p30_p1, %s3725_s11, %s32_s16  }
   0xc   : > { %p41_p5 = por %p40_p2, %p39_p0  ;;  %p3829_p6 = por %p46_p4, %p45_p3 }
   0xd   : > { %4892 = sst [smem:[#allocation9_spill]] %s3827_s18  ;;  %p243_p8 = scmp.eq.s32.totalorder %s2720_s14, 1 }
   0xe   : > { %p3834_p9 = por %p237_p7, %p39_p0  ;;  %p4890_p11 = scmp.ge.s32.totalorder %s3729_s12, 2 }
   0xf   : > { %p3838_p10 = por %p243_p8, %p45_p3 }
  0x10   : > { %283 = sbr.rel (%p4890_p11) target bundleno = 59 (0x3b), region = 48 }
  0x11   : > { %s4895_s21 = scalar_select %p3838_p10, 1, 0 }
  0x17   : > { %286 = sbr.rel (!%p41_p5) target bundleno = 59 (0x3b), region = 52  ;;  %s287_s22 = sand.u32 (%p41_p5), 1, %s3725_s11  }
  0x18   : > { %s292_s23 = smul.u32 (%p41_p5), 13, %s3729_s12  ;;  %s3850_s28 = scalar_lea.sflag (%p41_p5), [#allocation3], %s287_s22 }
  0x19   : > { %s3256_s24 = smul.u32 (%p41_p5), 728, %s287_s22 }
  0x1a   : > { %s293_s25 = ssub.s32 (%p41_p5), 25, %s292_s23 }
  0x1b   : > { %p294_p12 = scmp.lt.s32.totalorder (%p41_p5), %s293_s25, 13  ;;  %s291_s29 = scalar_lea.vmem (%p41_p5), [#allocation2], %s3256_s24 }
  0x1e   : > { %s4904_s25 = smov (!%p294_p12, %s293_s25), 13 }
  0x1f   : > { %s3847_s26 = smul.u32 896, %s4904_s25 }
  0x21   : > { %s299_s27 = ssub.s32 11648, %s3847_s26 }
  0x22   : > { %300 = vsyncadd %s3850_s28, %s299_s27  ;;  %p2725_p13 = scmp.ne.s32.totalorder %s3847_s26, 0  ;;  %s3266_s14 = smul.u32 11648, %s3729_s12 }
  0x23   : > { %s306_s16 = sshll.u32 %s291_s29, 4  ;;  %s3639_s27 = scalar_lea.hbm %s4879_s0, 22400  ;;  %s3860_s16 = int_to_ptr.vmem [resolvable:$true] %s306_s16 }
  0x24   : > { %s3858_s18 = scalar_lea.hbm %s4879_s0, %s3266_s14 }
  0x25   : > { %s3635_s22 = scalar_lea.hbm %s3858_s18, %s3847_s26  ;;  %p3640_p3 = scmp.lt.u32.totalorder %s3858_s18, %s4879_s0 }
  0x26   : > { %p3636_p0 = scmp.ne.s32.totalorder %s3858_s18, %s3635_s22  ;;  %p3641_p4 = scmp.lt.u32.totalorder %s3639_s27, %s3635_s22 }
  0x27   : > { %p3643_p7 = scmp.lt.u32.totalorder %s3635_s22, %s3858_s18 }
  0x28   : > { %p3637_p1 = pnand %p3636_p0, %p2725_p13  ;;  %p3642_p5 = por %p3641_p4, %p3640_p3 }
  0x2a   : > { %p3638_p2 = pneg %p3637_p1  ;;  %p3644_p8 = por %p3643_p7, %p3642_p5 }
  0x2c   : > { %p3645_p12 = pnand %p3644_p8, %p3638_p2 }
  0x2e   : > { %3648 = shalt.err (!%p3645_p12)
}
  0x2f   : > { %s3649_s14 = scalar_lea.vmem %s3860_s16, %s3847_s26  ;;  %s3731_s17 = smov [#allocation2]  }
  0x30   : > { %p3650_p0 = scmp.ne.s32.totalorder %s3860_s16, %s3649_s14  ;;  %s3653_s23 = sshll.u32 %s3731_s17, 4  ;;  %s3654_s23 = int_to_ptr.vmem [resolvable:$false] %s3653_s23 }
  0x31   : > { %s3655_s11 = scalar_lea.vmem %s3654_s23, 23296  ;;  %p3656_p10 = scmp.lt.s32.totalorder %s3860_s16, %s3654_s23 }
  0x32   : > { %p3651_p1 = pnand %p3650_p0, %p2725_p13  ;;  %p3657_p3 = scmp.lt.s32.totalorder %s3655_s11, %s3649_s14 }
  0x34   : > { %p3652_p11 = pneg %p3651_p1  ;;  %p3658_p4 = por %p3657_p3, %p3656_p10 }
  0x36   : > { %p3659_p5 = pnand %p3658_p4, %p3652_p11 }
  0x38   : > { %3662 = shalt.err (!%p3659_p5)
}
  0x39   : > { %s3732_s22 = smov 896   ;;  %s3733_s24 = smov 56  }
  0x3a   : > { %312 = dma.hbm_to_vmem [thread:$0]  (%p2725_p13), %s3858_s18, %s3847_s26, %s3860_s16, %s3850_s28, %s3732_s22, %s3732_s22, %s3733_s24  }
  0x3b PF: > { %p2728_p2 = scmp.ge.s32.totalorder %s3729_s12, 1  ;;  %p314_p7 = scmp.lt.s32.totalorder %s3729_s12, 3 }
  0x3d   : > { %p315_p8 = pnand %p2728_p2, %p314_p7 }
  0x3e   : > { %s3890_s25 = sand.u32 (!%p315_p8), 1, %s3721_s10  }
  0x3f   : > { %318 = sbr.rel (%p315_p8) target bundleno = 1186 (0x4a2), region = 56  ;;  %s321_s29 = scalar_lea.sflag (!%p315_p8), [#allocation3], %s3890_s25 }
  0x40   : > { %s3258_s27 = smul.u32 (!%p315_p8), 728, %s3890_s25 }
  0x42   : > { %s3896_s14 = scalar_lea.vmem (!%p315_p8), [#allocation2], %s3258_s27 }
  0x46   : > { %3708 = dma.done.wait (%p3829_p6), %s321_s29, 11648  }
  0x47   : > { %3710 = vsyncadd (%p3829_p6), %s321_s29, 4294955648  ;;  %v3308_v0 = vld [vmem:[%s4880_s1 + $0x40] sm:$0xff]   ;;  %v3312_v4 = vld [vmem:[%s4880_s1 + $0x48] sm:$0xff]   ;;  %v3734_v43 = vmov 0.0   ;;  %vm3735_vm0 = vmmov 0   ;;  %vm911_vm1 = vcmask 130048  }
  0x48   : > { %v3309_v1 = vld [vmem:[%s4880_s1] sm:$0xff]   ;;  %2867 = vmatprep.subr.bf16.mxu0 %v3308_v0  ;;  %v3313_v5 = vld [vmem:[%s4880_s1 + $0x8] sm:$0xff]   ;;  %v3316_v8 = vld [vmem:[%s4880_s1 + $0x50] sm:$0xff]   ;;  %s4622_s11 = scalar_lea.vmem [#allocation5], %s3258_s27  ;;  %s2626_s27 = scalar_lea.sflag [#allocation4], %s3890_s25 }
  0x49   : > { %v3310_v2 = vld [vmem:[%s4880_s1 + $0xc0] sm:$0xff]   ;;  %2868 = vmatpush3.bf16.msra.mxu0 %v3309_v1  ;;  %v3314_v6 = vld [vmem:[%s4880_s1 + $0xc8] sm:$0xff]   ;;  %v3317_v9 = vld [vmem:[%s4880_s1 + $0x10] sm:$0xff]   ;;  %s2633_s22 = smul.u32 (%p3834_p9), 13, %s3811_s13 }
  0x4a   : > { %v3311_v3 = vld [vmem:[%s4880_s1 + $0x80] sm:$0xff]   ;;  %2925 = vmatprep.subr.bf16.mxu1 %v3310_v2  ;;  %2869 = vmatprep.subr.bf16.mxu0 %v3312_v4  ;;  %v3315_v7 = vld [vmem:[%s4880_s1 + $0x88] sm:$0xff]   ;;  %v3318_v10 = vld [vmem:[%s4880_s1 + $0xd0] sm:$0xff]  }
  0x4b   : > { %2926 = vmatpush3.bf16.msra.mxu1 %v3311_v3  ;;  %v3319_v11 = vld [vmem:[%s4880_s1 + $0x90] sm:$0xff]   ;;  %v3320_v12 = vld [vmem:[%s4880_s1 + $0x58] sm:$0xff]   ;;  %v3324_v16 = vld [vmem:[%s4880_s1 + $0x60] sm:$0xff]   ;;  %s2634_s19 = ssub.s32 (%p3834_p9), 25, %s2633_s22 }
  0x4c   : > { %2927 = vmatprep.subr.bf16.mxu1 %v3314_v6  ;;  %v3321_v13 = vld [vmem:[%s4880_s1 + $0x18] sm:$0xff]   ;;  %v3325_v17 = vld [vmem:[%s4880_s1 + $0x20] sm:$0xff]   ;;  %v3328_v20 = vld [vmem:[%s4880_s1 + $0x68] sm:$0xff]   ;;  %p2635_p6 = scmp.lt.s32.totalorder (%p3834_p9), %s2634_s19, 13 }
  0x4d   : > { %2870 = vmatpush3.bf16.msra.mxu0 %v3313_v5  ;;  %v3322_v14 = vld [vmem:[%s4880_s1 + $0xd8] sm:$0xff]   ;;  %v3326_v18 = vld [vmem:[%s4880_s1 + $0xe0] sm:$0xff]   ;;  %v3329_v21 = vld [vmem:[%s4880_s1 + $0x28] sm:$0xff]  }
  0x4e   : > { %2871 = vmatprep.subr.bf16.mxu0 %v3316_v8  ;;  %v3323_v15 = vld [vmem:[%s4880_s1 + $0x98] sm:$0xff]   ;;  %v3327_v19 = vld [vmem:[%s4880_s1 + $0xa0] sm:$0xff]   ;;  %v3330_v22 = vld [vmem:[%s4880_s1 + $0xe8] sm:$0xff]  }
  0x4f   : > { %2928 = vmatpush3.bf16.msra.mxu1 %v3315_v7  ;;  %v3331_v23 = vld [vmem:[%s4880_s1 + $0xa8] sm:$0xff]   ;;  %v3332_v24 = vld [vmem:[%s4880_s1 + $0x70] sm:$0xff]   ;;  %v3336_v28 = vld [vmem:[%s4880_s1 + $0x78] sm:$0xff]  }
  0x50   : > { %2929 = vmatprep.subr.bf16.mxu1 %v3318_v10  ;;  %v3333_v25 = vld [vmem:[%s4880_s1 + $0x30] sm:$0xff]   ;;  %v3337_v29 = vld [vmem:[%s4880_s1 + $0x38] sm:$0xff]   ;;  %v373_v31 = vld [vmem:[%s3896_s14 + $0x8] sm:$0xff] }
  0x51   : > { %2872 = vmatpush3.bf16.msra.mxu0 %v3317_v9  ;;  %v3334_v26 = vld [vmem:[%s4880_s1 + $0xf0] sm:$0xff]   ;;  %v3338_v30 = vld [vmem:[%s4880_s1 + $0xf8] sm:$0xff]   ;;  %v3340_v38 = vld [vmem:[%s4880_s1 + $0x140] sm:$0xff]  }
  0x52   : > { %2873 = vmatprep.subr.bf16.mxu0 %v3320_v12  ;;  %v3335_v27 = vld [vmem:[%s4880_s1 + $0xb0] sm:$0xff]   ;;  %v380_v32 = vld [vmem:[%s3896_s14 + $0x40] sm:$0xff]  ;;  %v381_v45 = vld [vmem:[%s3896_s14 + $0x48] sm:$0xff] }
  0x53   : > { %2930 = vmatpush3.bf16.msra.mxu1 %v3319_v11  ;;  %v464_v33 = vpack.c.bf16 %v380_v32, %v373_v31  ;;  %v3339_v34 = vld [vmem:[%s4880_s1 + $0xb8] sm:$0xff]   ;;  %v382_v40 = vld [vmem:[%s3896_s14 + $0x50] sm:$0xff]  ;;  %v3341_v42 = vld [vmem:[%s4880_s1 + $0x100] sm:$0xff]  }
  0x54   : > { %2931 = vmatprep.subr.bf16.mxu1 %v3322_v14  ;;  %v372_v35 = vld [vmem:[%s3896_s14] sm:$0xff]  ;;  %v379_v36 = vld [vmem:[%s3896_s14 + $0x38] sm:$0xff]  ;;  %v374_v44 = vld [vmem:[%s3896_s14 + $0x10] sm:$0xff] }
  0x55   : > { %2874 = vmatpush3.bf16.msra.mxu0 %v3321_v13  ;;  %965 = vmatprep.mubr.bf16.mxu0 %v464_v33  ;;  %v463_v37 = vpack.c.bf16 %v379_v36, %v372_v35  ;;  %v375_v39 = vld [vmem:[%s3896_s14 + $0x18] sm:$0xff]  ;;  %v465_v46 = vpack.c.bf16 %v381_v45, %v374_v44  ;;  %v3342_v47 = vld [vmem:[%s4880_s1 + $0x180] sm:$0xff]   ;;  %v394_v49 = vld [vmem:[%s3896_s14 + $0xb0] sm:$0xff] }
  0x56   : > { %2875 = vmatprep.subr.bf16.mxu0 %v3324_v16  ;;  %v466_v41 = vpack.c.bf16 %v382_v40, %v375_v39  ;;  %v387_v48 = vld [vmem:[%s3896_s14 + $0x78] sm:$0xff]  ;;  %v3343_v51 = vld [vmem:[%s4880_s1 + $0x148] sm:$0xff]   ;;  %v396_v57 = vld [vmem:[%s3896_s14 + $0xc0] sm:$0xff] }
  0x57   : > { %2932 = vmatpush3.bf16.msra.mxu1 %v3323_v15  ;;  %v471_v50 = vpack.c.bf16 %v394_v49, %v387_v48  ;;  %v386_v52 = vld [vmem:[%s3896_s14 + $0x70] sm:$0xff]  ;;  %v393_v53 = vld [vmem:[%s3896_s14 + $0xa8] sm:$0xff]  ;;  %v388_v58 = vld [vmem:[%s3896_s14 + $0x80] sm:$0xff] }
  0x58   : > { %2933 = vmatprep.subr.bf16.mxu1 %v3326_v18  ;;  %1053 = vmatprep.mubr.bf16.mxu1 %v466_v41  ;;  %v470_v54 = vpack.c.bf16 %v393_v53, %v386_v52  ;;  %v3344_v55 = vld [vmem:[%s4880_s1 + $0x108] sm:$0xff]   ;;  %v395_v60 = vld [vmem:[%s3896_s14 + $0xb8] sm:$0xff]  ;;  %v408_v0 = vld [vmem:[%s3896_s14 + $0x120] sm:$0xff] }
  0x59   : > { %2876 = vmatpush3.bf16.msra.mxu0 %v3325_v17  ;;  %v389_v56 = vld [vmem:[%s3896_s14 + $0x88] sm:$0xff]  ;;  %v472_v61 = vpack.c.bf16 %v395_v60, %v388_v58  ;;  %v3345_v62 = vld [vmem:[%s4880_s1 + $0x150] sm:$0xff]   ;;  %v400_v3 = vld [vmem:[%s3896_s14 + $0xe0] sm:$0xff] }
  0x5a   : > { %2877 = vmatprep.subr.bf16.mxu0 %v3328_v20  ;;  %v473_v59 = vpack.c.bf16 %v396_v57, %v389_v56  ;;  %v401_v63 = vld [vmem:[%s3896_s14 + $0xe8] sm:$0xff]  ;;  %v3346_v2 = vld [vmem:[%s4880_s1 + $0x110] sm:$0xff]   ;;  %v3347_v10 = vld [vmem:[%s4880_s1 + $0x158] sm:$0xff]  }
  0x5b   : > { %2934 = vmatpush3.bf16.msra.mxu1 %v3327_v19  ;;  %v478_v1 = vpack.c.bf16 %v408_v0, %v401_v63  ;;  %v407_v4 = vld [vmem:[%s3896_s14 + $0x118] sm:$0xff]  ;;  %v410_v6 = vld [vmem:[%s3896_s14 + $0x130] sm:$0xff]  ;;  %v409_v8 = vld [vmem:[%s3896_s14 + $0x128] sm:$0xff] }
  0x5c   : > { %2935 = vmatprep.subr.bf16.mxu1 %v3330_v22  ;;  %v403_v5 = vld [vmem:[%s3896_s14 + $0xf8] sm:$0xff]  ;;  %v402_v7 = vld [vmem:[%s3896_s14 + $0xf0] sm:$0xff]  ;;  %v477_v11 = vpack.c.bf16 %v407_v4, %v400_v3  ;;  %v417_v16 = vld [vmem:[%s3896_s14 + $0x168] sm:$0xff] }
  0x5d   : > { %2878 = vmatpush3.bf16.msra.mxu0 %v3329_v21  ;;  %v480_v9 = vpack.c.bf16 %v410_v6, %v403_v5  ;;  %v3348_v12 = vld [vmem:[%s4880_s1 + $0x118] sm:$0xff]   ;;  %v422_v14 = vld [vmem:[%s3896_s14 + $0x190] sm:$0xff]  ;;  %v479_v18 = vpack.c.bf16 %v409_v8, %v402_v7  ;;  %v3349_v21 = vld [vmem:[%s4880_s1 + $0x160] sm:$0xff]  }
  0x5e   : > { %2879 = vmatprep.subr.bf16.mxu0 %v3332_v24  ;;  %v415_v13 = vld [vmem:[%s3896_s14 + $0x158] sm:$0xff]  ;;  %v424_v17 = vld [vmem:[%s3896_s14 + $0x1a0] sm:$0xff]  ;;  %v414_v19 = vld [vmem:[%s3896_s14 + $0x150] sm:$0xff] }
  0x5f   : > { %2936 = vmatpush3.bf16.msra.mxu1 %v3331_v23  ;;  %v485_v15 = vpack.c.bf16 %v422_v14, %v415_v13  ;;  %v487_v20 = vpack.c.bf16 %v424_v17, %v417_v16  ;;  %v421_v22 = vld [vmem:[%s3896_s14 + $0x188] sm:$0xff]  ;;  %v428_v35 = vld [vmem:[%s3896_s14 + $0x1c0] sm:$0xff]  ;;  %v435_v36 = vld [vmem:[%s3896_s14 + $0x1f8] sm:$0xff] }
  0x60   : > { %2937 = vmatprep.subr.bf16.mxu1 %v3334_v26  ;;  %v3350_v23 = vld [vmem:[%s4880_s1 + $0x120] sm:$0xff]   ;;  %v3351_v32 = vld [vmem:[%s4880_s1 + $0x168] sm:$0xff]   ;;  %v3353_v40 = vld [vmem:[%s4880_s1 + $0x170] sm:$0xff]  }
  0x61   : > { %2880 = vmatpush3.bf16.msra.mxu0 %v3333_v25  ;;  %v429_v24 = vld [vmem:[%s3896_s14 + $0x1c8] sm:$0xff]  ;;  %v436_v25 = vld [vmem:[%s3896_s14 + $0x200] sm:$0xff]  ;;  %v450_v39 = vld [vmem:[%s3896_s14 + $0x270] sm:$0xff] }
  0x62   : > { %2881 = vmatprep.subr.bf16.mxu0 %v3336_v28  ;;  %v416_v26 = vld [vmem:[%s3896_s14 + $0x160] sm:$0xff]  ;;  %v431_v28 = vld [vmem:[%s3896_s14 + $0x1d8] sm:$0xff]  ;;  %v492_v31 = vpack.c.bf16 %v436_v25, %v429_v24  ;;  %v3352_v33 = vld [vmem:[%s4880_s1 + $0x128] sm:$0xff]  }
  0x63   : > { %2938 = vmatpush3.bf16.msra.mxu1 %v3335_v27  ;;  %v423_v27 = vld [vmem:[%s3896_s14 + $0x198] sm:$0xff]  ;;  %v437_v44 = vld [vmem:[%s3896_s14 + $0x208] sm:$0xff]  ;;  %v452_v49 = vld [vmem:[%s3896_s14 + $0x280] sm:$0xff] }
  0x64   : > { %2939 = vmatprep.subr.bf16.mxu1 %v3338_v30  ;;  %v438_v30 = vld [vmem:[%s3896_s14 + $0x210] sm:$0xff]  ;;  %v445_v45 = vld [vmem:[%s3896_s14 + $0x248] sm:$0xff]  ;;  %v444_v57 = vld [vmem:[%s3896_s14 + $0x240] sm:$0xff] }
  0x65   : > { %2882 = vmatpush3.bf16.msra.mxu0 %v3337_v29  ;;  %v484_v29 = vpack.c.bf16 %v421_v22, %v414_v19  ;;  %v3354_v41 = vld [vmem:[%s4880_s1 + $0x130] sm:$0xff]   ;;  %v501_v52 = vpack.c.bf16 %v452_v49, %v445_v45  ;;  %v456_v63 = vld [vmem:[%s3896_s14 + $0x2a0] sm:$0xff]  ;;  %v377_v0 = vld [vmem:[%s3896_s14 + $0x28] sm:$0xff] }
  0x66   : > { %2983 = vmatprep.subr.bf16.mxu0 %v3340_v38  ;;  %v443_v38 = vld [vmem:[%s3896_s14 + $0x238] sm:$0xff]  ;;  %v442_v53 = vld [vmem:[%s3896_s14 + $0x230] sm:$0xff]  ;;  %v505_v3 = vpack.c.bf16 %v456_v63, %v456_v63  ;;  %v376_v6 = vld [vmem:[%s3896_s14 + $0x20] sm:$0xff] }
  0x67   : > { %2940 = vmatpush3.bf16.msra.mxu1 %v3339_v34  ;;  %v486_v34 = vpack.c.bf16 %v423_v27, %v416_v26  ;;  %v499_v48 = vpack.c.bf16 %v450_v39, %v443_v38  ;;  %v451_v58 = vld [vmem:[%s3896_s14 + $0x278] sm:$0xff]  ;;  %v397_v16 = vld [vmem:[%s3896_s14 + $0xc8] sm:$0xff]  ;;  %v392_v19 = vld [vmem:[%s3896_s14 + $0xa0] sm:$0xff] }
  0x68   : > { %3094 = vmatprep.subr.bf16.mxu1 %v3734_v43  ;;  %966 = vmatmul.mubr.bf16.vlgmr.msra.gmra.mrb[0].mxu0 %v463_v37  ;;  %v494_v37 = vpack.c.bf16 %v438_v30, %v431_v28  ;;  %v459_v60 = vld [vmem:[%s3896_s14 + $0x2b8] sm:$0xff]  ;;  %v405_v17 = vld [vmem:[%s3896_s14 + $0x108] sm:$0xff]  ;;  %v404_v24 = vld [vmem:[%s3896_s14 + $0x100] sm:$0xff] }
  0x69   : > { %2984 = vmatpush3.bf16.msra.mxu0 %v3341_v42  ;;  %973 = vmatprep.mubr.bf16.mxu0 %v471_v50  ;;  %v430_v42 = vld [vmem:[%s3896_s14 + $0x1d0] sm:$0xff]  ;;  %v3356_v50 = vld [vmem:[%s4880_s1 + $0x138] sm:$0xff]   ;;  %v441_v49 = vld [vmem:[%s3896_s14 + $0x228] sm:$0xff] }
  0x6a   : > { %1054 = vmatmul.mubr.bf16.vlgmr.msra.gmra.mrb[0].mxu1 %v465_v46  ;;  %2985 = vmatprep.subr.bf16.mxu0 %v3343_v51  ;;  %v491_v46 = vpack.c.bf16 %v435_v36, %v428_v35  ;;  %v493_v51 = vpack.c.bf16 %v437_v44, %v430_v42  ;;  %v383_v7 = vld [vmem:[%s3896_s14 + $0x58] sm:$0xff]  ;;  %v426_v27 = vld [vmem:[%s3896_s14 + $0x1b0] sm:$0xff]  ;;  %v433_v35 = vld [vmem:[%s3896_s14 + $0x1e8] sm:$0xff] }
  0x6b   : > { %3095 = vmatpush3.bf16.msra.mxu1 %v3342_v47  ;;  %1061 = vmatprep.mubr.bf16.mxu1 %v473_v59  ;;  %v3355_v47 = vld [vmem:[%s4880_s1 + $0x178] sm:$0xff]   ;;  %v406_v28 = vld [vmem:[%s3896_s14 + $0x110] sm:$0xff]  ;;  %v3357_v63 = vld [vmem:[%s4882_s3] sm:$0xff]  }
  0x6c   : > { %3168 = vmatprep.subr.bf16.mxu1 %v3734_v43  ;;  %v391_v8 = vld [vmem:[%s3896_s14 + $0x98] sm:$0xff]  ;;  %v440_v36 = vld [vmem:[%s3896_s14 + $0x220] sm:$0xff] }
  0x6d   : > { %2986 = vmatpush3.bf16.msra.mxu0 %v3344_v55  ;;  %v457_v55 = vld [vmem:[%s3896_s14 + $0x2a8] sm:$0xff]  ;;  %v411_v25 = vld [vmem:[%s3896_s14 + $0x138] sm:$0xff]  ;;  %v420_v38 = vld [vmem:[%s3896_s14 + $0x180] sm:$0xff] }
  0x6e   : > { %2987 = vmatprep.subr.bf16.mxu0 %v3345_v62  ;;  %v506_v59 = vpack.c.bf16 %v457_v55, %v457_v55  ;;  %v508_v62 = vpack.c.bf16 %v459_v60, %v459_v60  ;;  %v419_v26 = vld [vmem:[%s3896_s14 + $0x178] sm:$0xff]  ;;  %v481_v30 = vpack.c.bf16 %v411_v25, %v404_v24  ;;  %v432_v42 = vld [vmem:[%s3896_s14 + $0x1e0] sm:$0xff] }
  0x6f   : > { %v427_v39 = vld [vmem:[%s3896_s14 + $0x1b8] sm:$0xff]  ;;  %v460_v60 = vld [vmem:[%s3896_s14 + $0x2c0] sm:$0xff] }
  0x70   : > { %974 = vmatmul.mubr.bf16.gmra.mrb[4].mxu0 %v470_v54  ;;  %v449_v54 = vld [vmem:[%s3896_s14 + $0x268] sm:$0xff]  ;;  %v439_v44 = vld [vmem:[%s3896_s14 + $0x218] sm:$0xff] }
  0x71   : > { %981 = vmatprep.mubr.bf16.mxu0 %v478_v1  ;;  %2988 = vmatpush3.bf16.msra.mxu0 %v3346_v2  ;;  %v498_v56 = vpack.c.bf16 %v449_v54, %v442_v53  ;;  %v384_v1 = vld [vmem:[%s3896_s14 + $0x60] sm:$0xff]  ;;  %v458_v2 = vld [vmem:[%s3896_s14 + $0x2b0] sm:$0xff]  ;;  %v447_v45 = vld [vmem:[%s3896_s14 + $0x258] sm:$0xff] }
  0x72   : > { %1062 = vmatmul.mubr.bf16.gmra.mrb[4].mxu1 %v472_v61  ;;  %2989 = vmatprep.subr.bf16.mxu0 %v3347_v10  ;;  %v500_v61 = vpack.c.bf16 %v451_v58, %v444_v57  ;;  %v468_v4 = vpack.c.bf16 %v384_v1, %v377_v0  ;;  %v507_v5 = vpack.c.bf16 %v458_v2, %v458_v2  ;;  %v378_v10 = vld [vmem:[%s3896_s14 + $0x30] sm:$0xff]  ;;  %v453_v53 = vld [vmem:[%s3896_s14 + $0x288] sm:$0xff]  ;;  %v455_v57 = vld [vmem:[%s3896_s14 + $0x298] sm:$0xff] }
  0x73   : > { %1069 = vmatprep.mubr.bf16.mxu1 %v480_v9  ;;  %v398_v9 = vld [vmem:[%s3896_s14 + $0xd0] sm:$0xff]  ;;  %v461_v54 = vld [vmem:[%s3896_s14 + $0x2c8] sm:$0xff] }
  0x74   : > { %v475_v13 = vpack.c.bf16 %v398_v9, %v391_v8  ;;  %v510_v58 = vpack.c.bf16 %v461_v54, %v461_v54  ;;  %v3358_v1 = vld [vmem:[%s4882_s3 + $0x8] sm:$0xff]   ;;  %v3359_v2 = vld [vmem:[%s4882_s3 + $0x10] sm:$0xff]   ;;  %v3365_v8 = vld [vmem:[%s4884_s5] sm:$0xff]  }
  0x75   : > { %2990 = vmatpush3.bf16.msra.mxu0 %v3348_v12  ;;  %v467_v12 = vpack.c.bf16 %v383_v7, %v376_v6  ;;  %v3363_v6 = vld [vmem:[%s4882_s3 + $0x30] sm:$0xff]   ;;  %v3364_v7 = vld [vmem:[%s4882_s3 + $0x38] sm:$0xff]   ;;  %v3366_v9 = vld [vmem:[%s4884_s5 + $0x8] sm:$0xff]  }
  0x76   : > { %2991 = vmatprep.subr.bf16.mxu0 %v3349_v21 }
  0x78   : > { %982 = vmatmul.mubr.bf16.gmra.mrb[8].mxu0 %v477_v11  ;;  %v385_v11 = vld [vmem:[%s3896_s14 + $0x68] sm:$0xff] }
  0x79   : > { %989 = vmatprep.mubr.bf16.mxu0 %v485_v15  ;;  %2992 = vmatpush3.bf16.msra.mxu0 %v3350_v23  ;;  %v469_v14 = vpack.c.bf16 %v385_v11, %v378_v10  ;;  %v390_v15 = vld [vmem:[%s3896_s14 + $0x90] sm:$0xff] }
  0x7a   : > { %1070 = vmatmul.mubr.bf16.gmra.mrb[8].mxu1 %v479_v18  ;;  %2993 = vmatprep.subr.bf16.mxu0 %v3351_v32  ;;  %v412_v18 = vld [vmem:[%s3896_s14 + $0x140] sm:$0xff]  ;;  %v474_v21 = vpack.c.bf16 %v397_v16, %v390_v15  ;;  %v3367_v10 = vld [vmem:[%s4884_s5 + $0x10] sm:$0xff]  }
  0x7b   : > { %1077 = vmatprep.mubr.bf16.mxu1 %v487_v20  ;;  %v399_v20 = vld [vmem:[%s3896_s14 + $0xd8] sm:$0xff]  ;;  %v482_v22 = vpack.c.bf16 %v412_v18, %v405_v17 }
  0x7c   : > { %v476_v23 = vpack.c.bf16 %v399_v20, %v392_v19 }
  0x7d   : > { %2994 = vmatpush3.bf16.msra.mxu0 %v3352_v33  ;;  %v418_v33 = vld [vmem:[%s3896_s14 + $0x170] sm:$0xff] }
  0x7e   : > { %2995 = vmatprep.subr.bf16.mxu0 %v3353_v40  ;;  %v496_v40 = vpack.c.bf16 %v440_v36, %v433_v35 }
  0x80   : > { %990 = vmatmul.mubr.bf16.gmra.mrb[12].mxu0 %v484_v29  ;;  %v413_v29 = vld [vmem:[%s3896_s14 + $0x148] sm:$0xff] }
  0x81   : > { %997 = vmatprep.mubr.bf16.mxu0 %v492_v31  ;;  %2996 = vmatpush3.bf16.msra.mxu0 %v3354_v41  ;;  %v489_v31 = vpack.c.bf16 %v426_v27, %v419_v26  ;;  %v483_v32 = vpack.c.bf16 %v413_v29, %v406_v28  ;;  %v490_v41 = vpack.c.bf16 %v427_v39, %v420_v38 }
  0x82   : > { %1078 = vmatmul.mubr.bf16.gmra.mrb[12].mxu1 %v486_v34  ;;  %2997 = vmatprep.subr.bf16.mxu0 %v3355_v47  ;;  %v425_v34 = vld [vmem:[%s3896_s14 + $0x1a8] sm:$0xff]  ;;  %v495_v47 = vpack.c.bf16 %v439_v44, %v432_v42 }
  0x83   : > { %1085 = vmatprep.mubr.bf16.mxu1 %v494_v37  ;;  %v488_v37 = vpack.c.bf16 %v425_v34, %v418_v33 }
  0x85   : > { %2998 = vmatpush3.bf16.msra.mxu0 %v3356_v50 }
  0x86   : > { %3124 = vmatprep.subr.bf16.mxu0 %v3734_v43 }
  0x88   : > { %998 = vmatmul.mubr.bf16.gmra.mrb[16].mxu0 %v491_v46  ;;  %v454_v46 = vld [vmem:[%s3896_s14 + $0x290] sm:$0xff] }
  0x89   : > { %1005 = vmatprep.mubr.bf16.mxu0 %v499_v48  ;;  %v434_v48 = vld [vmem:[%s3896_s14 + $0x1f0] sm:$0xff]  ;;  %v503_v50 = vpack.c.bf16 %v454_v46, %v447_v45 }
  0x8a   : > { %1086 = vmatmul.mubr.bf16.gmra.mrb[16].mxu1 %v493_v51  ;;  %v497_v51 = vpack.c.bf16 %v441_v49, %v434_v48 }
  0x8b   : > { %1093 = vmatprep.mubr.bf16.mxu1 %v501_v52  ;;  %v446_v52 = vld [vmem:[%s3896_s14 + $0x250] sm:$0xff] }
  0x8c   : > { %v502_v55 = vpack.c.bf16 %v453_v53, %v446_v52 }
  0x90   : > { %1006 = vmatmul.mubr.bf16.gmra.mrb[20].mxu0 %v498_v56  ;;  %v448_v56 = vld [vmem:[%s3896_s14 + $0x260] sm:$0xff] }
  0x91   : > { %1013 = vmatprep.mubr.bf16.mxu0 %v506_v59  ;;  %v504_v59 = vpack.c.bf16 %v455_v57, %v448_v56 }
  0x92   : > { %1094 = vmatmul.mubr.bf16.gmra.mrb[20].mxu1 %v500_v61  ;;  %v509_v61 = vpack.c.bf16 %v460_v60, %v460_v60 }
  0x93   : > { %1101 = vmatprep.mubr.bf16.mxu1 %v508_v62  ;;  %v462_v62 = vld [vmem:[%s3896_s14 + $0x2d0] sm:$0xff] }
  0x94   : > { %v511_v0 = vpack.c.bf16 %v462_v62, %v462_v62 }
  0x98   : > { %1014 = vmatmul.mubr.bf16.gmra.mrb[24].mxu0 %v505_v3  ;;  %v3360_v3 = vld [vmem:[%s4882_s3 + $0x18] sm:$0xff]  }
  0x99   : > { %1141 = vmatprep.mubr.bf16.mxu0 %v468_v4  ;;  %v3361_v4 = vld [vmem:[%s4882_s3 + $0x20] sm:$0xff]  }
  0x9a   : > { %1102 = vmatmul.mubr.bf16.gmra.mrb[24].mxu1 %v507_v5  ;;  %v3362_v5 = vld [vmem:[%s4882_s3 + $0x28] sm:$0xff]  }
  0x9b   : > { %3096 = vmatprep.mubr.msk.bf16.mxu1 %vm3735_vm0, %v3734_v43 }
  0xa0   : > { %1142 = vmatmul.mubr.bf16.vlgmr.msra.gmra.mrb[28].mxu0 %v467_v12  ;;  %v3368_v12 = vld [vmem:[%s4884_s5 + $0x18] sm:$0xff]  }
  0xa1   : > { %1149 = vmatprep.mubr.bf16.mxu0 %v475_v13  ;;  %3125 = vmatpush3.bf16.msra.mxu0 %v3357_v63  ;;  %v4216_v13 = vld [vmem:[%s4881_s2] ss:$0 sm:$0xff] }
  0xa2   : > { %3097 = vmatmul.mubr.msk.bf16.vlgmr.msra.gmra.mrb[28].mxu1 %vm911_vm1, %v469_v14  ;;  %3126 = vmatprep.subr.bf16.mxu0 %v3734_v43 }
  0xa3   : > { %3100 = vmatprep.mubr.msk.bf16.mxu1 %vm3735_vm0, %v3734_v43  ;;  %3169 = vmatpush3.bf16.msra.mxu1 %v3365_v8 }
  0xa4   : > { %3170 = vmatprep.subr.bf16.mxu1 %v3734_v43 }
  0xa5   : > { %3127 = vmatpush3.bf16.msra.mxu0 %v3358_v1 }
  0xa6   : > { %3128 = vmatprep.subr.bf16.mxu0 %v3734_v43 }
  0xa7   : > { %3171 = vmatpush3.bf16.msra.mxu1 %v3366_v9 }
  0xa8   : > { %1150 = vmatmul.mubr.bf16.gmra.mrb[32].mxu0 %v474_v21  ;;  %3172 = vmatprep.subr.bf16.mxu1 %v3734_v43 }
  0xa9   : > { %1157 = vmatprep.mubr.bf16.mxu0 %v482_v22  ;;  %3129 = vmatpush3.bf16.msra.mxu0 %v3359_v2  ;;  %v3369_v22 = vld [vmem:[%s4884_s5 + $0x20] sm:$0xff]  }
  0xaa   : > { %3101 = vmatmul.mubr.msk.bf16.gmra.mrb[32].mxu1 %vm911_vm1, %v476_v23  ;;  %3130 = vmatprep.subr.bf16.mxu0 %v3734_v43 }
  0xab   : > { %3104 = vmatprep.mubr.msk.bf16.mxu1 %vm3735_vm0, %v3734_v43  ;;  %3173 = vmatpush3.bf16.msra.mxu1 %v3367_v10 }
  0xac   : > { %3174 = vmatprep.subr.bf16.mxu1 %v3734_v43 }
  0xad   : > { %3131 = vmatpush3.bf16.msra.mxu0 %v3360_v3 }
  0xae   : > { %3132 = vmatprep.subr.bf16.mxu0 %v3734_v43 }
  0xaf   : > { %3175 = vmatpush3.bf16.msra.mxu1 %v3368_v12 }
  0xb0   : > { %1158 = vmatmul.mubr.bf16.gmra.mrb[36].mxu0 %v481_v30  ;;  %3176 = vmatprep.subr.bf16.mxu1 %v3734_v43  ;;  %v3370_v30 = vld [vmem:[%s4884_s5 + $0x28] sm:$0xff]  }
  0xb1   : > { %1165 = vmatprep.mubr.bf16.mxu0 %v489_v31  ;;  %3133 = vmatpush3.bf16.msra.mxu0 %v3361_v4 }
  0xb2   : > { %3105 = vmatmul.mubr.msk.bf16.gmra.mrb[36].mxu1 %vm911_vm1, %v483_v32  ;;  %3134 = vmatprep.subr.bf16.mxu0 %v3734_v43 }
  0xb3   : > { %3108 = vmatprep.mubr.msk.bf16.mxu1 %vm3735_vm0, %v3734_v43  ;;  %3177 = vmatpush3.bf16.msra.mxu1 %v3369_v22 }
  0xb4   : > { %3178 = vmatprep.subr.bf16.mxu1 %v3734_v43 }
  0xb5   : > { %3135 = vmatpush3.bf16.msra.mxu0 %v3362_v5 }
  0xb6   : > { %3136 = vmatprep.subr.bf16.mxu0 %v3734_v43 }
  0xb7   : > { %3179 = vmatpush3.bf16.msra.mxu1 %v3370_v30 }
  0xb8   : > { %1166 = vmatmul.mubr.bf16.gmra.mrb[40].mxu0 %v488_v37  ;;  %3180 = vmatprep.subr.bf16.mxu1 %v3734_v43 }
  0xb9   : > { %1173 = vmatprep.mubr.bf16.mxu0 %v496_v40  ;;  %3137 = vmatpush3.bf16.msra.mxu0 %v3363_v6  ;;  %v3371_v40 = vld [vmem:[%s4884_s5 + $0x30] sm:$0xff]  }
  0xba   : > { %3109 = vmatmul.mubr.msk.bf16.gmra.mrb[40].mxu1 %vm911_vm1, %v490_v41  ;;  %3138 = vmatprep.subr.bf16.mxu0 %v3734_v43 }
  0xbb   : > { %3112 = vmatprep.mubr.msk.bf16.mxu1 %vm3735_vm0, %v3734_v43  ;;  %3181 = vmatpush3.bf16.msra.mxu1 %v3371_v40 }
  0xbc   : > { %3182 = vmatprep.subr.bf16.mxu1 %v3734_v43 }
  0xbd   : > { %3139 = vmatpush3.bf16.msra.mxu0 %v3364_v7 }
  0xc0   : > { %1174 = vmatmul.mubr.bf16.gmra.mrb[44].mxu0 %v495_v47 }
  0xc1   : > { %1181 = vmatprep.mubr.bf16.mxu0 %v503_v50 }
  0xc2   : > { %3113 = vmatmul.mubr.msk.bf16.gmra.mrb[44].mxu1 %vm911_vm1, %v497_v51 }
  0xc3   : > { %3116 = vmatprep.mubr.msk.bf16.mxu1 %vm3735_vm0, %v3734_v43 }
  0xc8   : > { %1182 = vmatmul.mubr.bf16.gmra.mrb[48].mxu0 %v502_v55 }
  0xc9   : > { %1189 = vmatprep.mubr.bf16.mxu0 %v510_v58 }
  0xca   : > { %3117 = vmatmul.mubr.msk.bf16.gmra.mrb[48].mxu1 %vm911_vm1, %v504_v59 }
  0xcb   : > { %3120 = vmatprep.mubr.msk.bf16.mxu1 %vm3735_vm0, %v3734_v43 }
  0xd0   : > { %1190 = vmatmul.mubr.bf16.gmra.mrb[52].mxu0 %v509_v61 }
  0xd1   : > { %3140 = vmatprep.mubr.msk.bf16.mxu0 %vm3735_vm0, %v3734_v43 }
  0xd2   : > { %3121 = vmatmul.mubr.msk.bf16.gmra.mrb[52].mxu1 %vm911_vm1, %v511_v0 }
  0xd3   : > { %3184 = vmatprep.mubr.msk.bf16.mxu1 %vm3735_vm0, %v3734_v43 }
 0x13b   : > { %v2883_v11 = vpop.f32.mrb[0].mxu0 }
 0x13c   : > { %v2884_v14 = vpop.f32.mrb[1].mxu0 }
 0x13d   : > { %v2885_v15 = vadd.f32 %v2884_v14, %v2883_v11  ;;  %v2886_v16 = vpop.f32.mrb[2].mxu0  ;;  %v2941_v17 = vpop.f32.mrb[0].mxu1 }
 0x13e   : > { %v2887_v18 = vpop.f32.mrb[3].mxu0  ;;  %v2942_v21 = vpop.f32.mrb[1].mxu1 }
 0x13f   : > { %v968_v19 = vadd.f32 %v2885_v15, %v4216_v13  ;;  %v2888_v20 = vadd.f32 %v2887_v18, %v2886_v16  ;;  %v2943_v23 = vadd.f32 %v2942_v21, %v2941_v17  ;;  %v2944_v24 = vpop.f32.mrb[2].mxu1 }
 0x140   : > { %v2945_v26 = vpop.f32.mrb[3].mxu1 }
 0x141   : > { %v971_v25 = vadd.f32 %v2888_v20, %v4216_v13  ;;  %v4225_v27 = vadd.f32 %v2943_v23, %v968_v19  ;;  %v2946_v28 = vadd.f32 %v2945_v26, %v2944_v24 }
 0x143   : > { %v2889_v29 = vpop.f32.mrb[4].mxu0  ;;  %v4230_v31 = vadd.f32 %v2946_v28, %v971_v25 }
 0x144   : > { %v2890_v32 = vpop.f32.mrb[5].mxu0 }
 0x145   : > { %v2891_v33 = vadd.f32 %v2890_v32, %v2889_v29  ;;  %v2892_v34 = vpop.f32.mrb[6].mxu0  ;;  %v2947_v35 = vpop.f32.mrb[4].mxu1 }
 0x146   : > { %v2893_v36 = vpop.f32.mrb[7].mxu0  ;;  %v2948_v39 = vpop.f32.mrb[5].mxu1 }
 0x147   : > { %v976_v37 = vadd.f32 %v2891_v33, %v4216_v13  ;;  %v2894_v38 = vadd.f32 %v2893_v36, %v2892_v34  ;;  %v2949_v41 = vadd.f32 %v2948_v39, %v2947_v35  ;;  %v2950_v42 = vpop.f32.mrb[6].mxu1 }
 0x148   : > { %v2951_v45 = vpop.f32.mrb[7].mxu1 }
 0x149   : > { %v979_v44 = vadd.f32 %v2894_v38, %v4216_v13  ;;  %v4239_v46 = vadd.f32 %v2949_v41, %v976_v37  ;;  %v2952_v47 = vadd.f32 %v2951_v45, %v2950_v42 }
 0x14b   : > { %v2895_v48 = vpop.f32.mrb[8].mxu0  ;;  %v4241_v49 = vadd.f32 %v2952_v47, %v979_v44 }
 0x14c   : > { %v2896_v50 = vpop.f32.mrb[9].mxu0 }
 0x14d   : > { %v2897_v51 = vadd.f32 %v2896_v50, %v2895_v48  ;;  %v2898_v52 = vpop.f32.mrb[10].mxu0  ;;  %v2953_v53 = vpop.f32.mrb[8].mxu1 }
 0x14e   : > { %v2899_v54 = vpop.f32.mrb[11].mxu0  ;;  %v2954_v57 = vpop.f32.mrb[9].mxu1 }
 0x14f   : > { %v984_v55 = vadd.f32 %v2897_v51, %v4216_v13  ;;  %v2900_v56 = vadd.f32 %v2899_v54, %v2898_v52  ;;  %v2955_v58 = vadd.f32 %v2954_v57, %v2953_v53  ;;  %v2956_v59 = vpop.f32.mrb[10].mxu1 }
 0x150   : > { %v2957_v61 = vpop.f32.mrb[11].mxu1 }
 0x151   : > { %v987_v60 = vadd.f32 %v2900_v56, %v4216_v13  ;;  %v4246_v62 = vadd.f32 %v2955_v58, %v984_v55  ;;  %v2958_v63 = vadd.f32 %v2957_v61, %v2956_v59 }
 0x153   : > { %v2901_v0 = vpop.f32.mrb[12].mxu0  ;;  %v4248_v1 = vadd.f32 %v2958_v63, %v987_v60 }
 0x154   : > { %v2902_v2 = vpop.f32.mrb[13].mxu0 }
 0x155   : > { %v2903_v3 = vadd.f32 %v2902_v2, %v2901_v0  ;;  %v2904_v4 = vpop.f32.mrb[14].mxu0  ;;  %v2959_v5 = vpop.f32.mrb[12].mxu1 }
 0x156   : > { %v2905_v6 = vpop.f32.mrb[15].mxu0  ;;  %v2960_v9 = vpop.f32.mrb[13].mxu1 }
 0x157   : > { %v992_v7 = vadd.f32 %v2903_v3, %v4216_v13  ;;  %v2906_v8 = vadd.f32 %v2905_v6, %v2904_v4  ;;  %v2961_v10 = vadd.f32 %v2960_v9, %v2959_v5  ;;  %v2962_v11 = vpop.f32.mrb[14].mxu1 }
 0x158   : > { %v2963_v14 = vpop.f32.mrb[15].mxu1 }
 0x159   : > { %v995_v12 = vadd.f32 %v2906_v8, %v4216_v13  ;;  %v4252_v15 = vadd.f32 %v2961_v10, %v992_v7  ;;  %v2964_v16 = vadd.f32 %v2963_v14, %v2962_v11 }
 0x15b   : > { %v2907_v17 = vpop.f32.mrb[16].mxu0  ;;  %v4254_v18 = vadd.f32 %v2964_v16, %v995_v12 }
 0x15c   : > { %v2908_v19 = vpop.f32.mrb[17].mxu0 }
 0x15d   : > { %v2909_v20 = vadd.f32 %v2908_v19, %v2907_v17  ;;  %v2910_v21 = vpop.f32.mrb[18].mxu0  ;;  %v2965_v22 = vpop.f32.mrb[16].mxu1 }
 0x15e   : > { %v2911_v23 = vpop.f32.mrb[19].mxu0  ;;  %v2966_v26 = vpop.f32.mrb[17].mxu1 }
 0x15f   : > { %v1000_v24 = vadd.f32 %v2909_v20, %v4216_v13  ;;  %v2912_v25 = vadd.f32 %v2911_v23, %v2910_v21  ;;  %v2967_v28 = vadd.f32 %v2966_v26, %v2965_v22  ;;  %v2968_v29 = vpop.f32.mrb[18].mxu1 }
 0x160   : > { %v2969_v32 = vpop.f32.mrb[19].mxu1 }
 0x161   : > { %v1003_v30 = vadd.f32 %v2912_v25, %v4216_v13  ;;  %v4258_v33 = vadd.f32 %v2967_v28, %v1000_v24  ;;  %v2970_v34 = vadd.f32 %v2969_v32, %v2968_v29 }
 0x163   : > { %v2913_v35 = vpop.f32.mrb[20].mxu0  ;;  %v4260_v36 = vadd.f32 %v2970_v34, %v1003_v30 }
 0x164   : > { %v2914_v37 = vpop.f32.mrb[21].mxu0 }
 0x165   : > { %v2915_v38 = vadd.f32 %v2914_v37, %v2913_v35  ;;  %v2916_v39 = vpop.f32.mrb[22].mxu0  ;;  %v2971_v40 = vpop.f32.mrb[20].mxu1 }
 0x166   : > { %v2917_v41 = vpop.f32.mrb[23].mxu0  ;;  %v2972_v45 = vpop.f32.mrb[21].mxu1 }
 0x167   : > { %v1008_v42 = vadd.f32 %v2915_v38, %v4216_v13  ;;  %v2918_v44 = vadd.f32 %v2917_v41, %v2916_v39  ;;  %v2973_v47 = vadd.f32 %v2972_v45, %v2971_v40  ;;  %v2974_v48 = vpop.f32.mrb[22].mxu1 }
 0x168   : > { %v2975_v51 = vpop.f32.mrb[23].mxu1 }
 0x169   : > { %v1011_v50 = vadd.f32 %v2918_v44, %v4216_v13  ;;  %v4264_v52 = vadd.f32 %v2973_v47, %v1008_v42  ;;  %v2976_v53 = vadd.f32 %v2975_v51, %v2974_v48 }
 0x16b   : > { %v2919_v54 = vpop.f32.mrb[24].mxu0  ;;  %v4266_v55 = vadd.f32 %v2976_v53, %v1011_v50 }
 0x16c   : > { %v2920_v56 = vpop.f32.mrb[25].mxu0 }
 0x16d   : > { %v2921_v57 = vadd.f32 %v2920_v56, %v2919_v54  ;;  %v2922_v58 = vpop.f32.mrb[26].mxu0  ;;  %v2977_v59 = vpop.f32.mrb[24].mxu1 }
 0x16e   : > { %v2923_v60 = vpop.f32.mrb[27].mxu0  ;;  %v2978_v63 = vpop.f32.mrb[25].mxu1 }
 0x16f   : > { %v1016_v61 = vadd.f32 %v2921_v57, %v4216_v13  ;;  %v2979_v0 = vadd.f32 %v2978_v63, %v2977_v59  ;;  %v2980_v2 = vpop.f32.mrb[26].mxu1 }
 0x170   : > { %v2981_v3 = vpop.f32.mrb[27].mxu1 }
 0x171   : > { %v4269_v4 = vadd.f32 %v2979_v0, %v1016_v61 }
 0x173   : > { %v2999_v5 = vpop.f32.mrb[28].mxu0 }
 0x174   : > { %v3000_v6 = vpop.f32.mrb[29].mxu0 }
 0x175   : > { %v3001_v7 = vadd.f32 %v3000_v6, %v2999_v5  ;;  %v3002_v8 = vpop.f32.mrb[30].mxu0  ;;  %v1231_v10 = vpop.f32.mrb[28].mxu1 }
 0x176   : > { %v3003_v9 = vpop.f32.mrb[31].mxu0  ;;  %v3098_v14 = vpop.f32.mrb[29].mxu1 }
 0x177   : > { %v3004_v11 = vadd.f32 %v3003_v9, %v3002_v8  ;;  %v1144_v12 = vadd.f32 %v3001_v7, %v4225_v27  ;;  %v1234_v16 = vpop.f32.mrb[30].mxu1 }
 0x178   : > { %v3099_v19 = vpop.f32.mrb[31].mxu1 }
 0x179   : > { %v1232_v17 = vadd.f32 %v1231_v10, %v1144_v12  ;;  %v1147_v13 = vadd.f32 %v3004_v11, %v4230_v31 }
 0x17b   : > { %v1235_v20 = vadd.f32 %v1234_v16, %v1147_v13  ;;  %v3005_v21 = vpop.f32.mrb[32].mxu0  ;;  %v1285_v23 = vmax.f32 %v1232_v17, 0.0 }
 0x17c   : > { %v3006_v22 = vpop.f32.mrb[33].mxu0 }
 0x17d   : > { %v1286_v24 = vmax.f32 %v1235_v20, 0.0  ;;  %v3007_v25 = vadd.f32 %v3006_v22, %v3005_v21  ;;  %v3008_v26 = vpop.f32.mrb[34].mxu0  ;;  %v1239_v29 = vpop.f32.mrb[32].mxu1 }
 0x17e   : > { %v3009_v28 = vpop.f32.mrb[35].mxu0  ;;  %v3102_v27 = vpop.f32.mrb[33].mxu1 }
 0x17f   : > { %v1298_v30 = vpack.c.bf16 %v1286_v24, %v1285_v23  ;;  %v3010_v32 = vadd.f32 %v3009_v28, %v3008_v26  ;;  %v1152_v34 = vadd.f32 %v3007_v25, %v4239_v46  ;;  %v1242_v35 = vpop.f32.mrb[34].mxu1 }
 0x180   : > { %v3103_v31 = vpop.f32.mrb[35].mxu1 }
 0x181   : > { %v1240_v37 = vadd.f32 %v1239_v29, %v1152_v34  ;;  %v1155_v38 = vadd.f32 %v3010_v32, %v4241_v49  ;;  %3141 = vmatmul.mubr.bf16.vlgmr.msra.gmra.mrb[56].mxu0 %v1298_v30 }
 0x182   : > { %3144 = vmatprep.mubr.msk.bf16.mxu0 %vm3735_vm0, %v3734_v43 }
 0x183   : > { %v1243_v39 = vadd.f32 %v1242_v35, %v1155_v38  ;;  %v3011_v40 = vpop.f32.mrb[36].mxu0  ;;  %v1287_v42 = vmax.f32 %v1240_v37, 0.0 }
 0x184   : > { %v3012_v41 = vpop.f32.mrb[37].mxu0 }
 0x185   : > { %v1288_v44 = vmax.f32 %v1243_v39, 0.0  ;;  %v3013_v45 = vadd.f32 %v3012_v41, %v3011_v40  ;;  %v3014_v47 = vpop.f32.mrb[38].mxu0  ;;  %v1247_v50 = vpop.f32.mrb[36].mxu1 }
 0x186   : > { %v3015_v48 = vpop.f32.mrb[39].mxu0  ;;  %v3106_v54 = vpop.f32.mrb[37].mxu1 }
 0x187   : > { %v1299_v46 = vpack.c.bf16 %v1288_v44, %v1287_v42  ;;  %v3016_v51 = vadd.f32 %v3015_v48, %v3014_v47  ;;  %v1160_v53 = vadd.f32 %v3013_v45, %v4246_v62  ;;  %v1250_v49 = vpop.f32.mrb[38].mxu1 }
 0x188   : > { %v3107_v58 = vpop.f32.mrb[39].mxu1 }
 0x189   : > { %v1248_v56 = vadd.f32 %v1247_v50, %v1160_v53  ;;  %v1163_v57 = vadd.f32 %v3016_v51, %v4248_v1  ;;  %3145 = vmatmul.mubr.bf16.gmra.mrb[60].mxu0 %v1299_v46 }
 0x18a   : > { %3148 = vmatprep.mubr.msk.bf16.mxu0 %vm3735_vm0, %v3734_v43 }
 0x18b   : > { %v1251_v59 = vadd.f32 %v1250_v49, %v1163_v57  ;;  %v3017_v60 = vpop.f32.mrb[40].mxu0  ;;  %v1289_v63 = vmax.f32 %v1248_v56, 0.0 }
 0x18c   : > { %v3018_v61 = vpop.f32.mrb[41].mxu0 }
 0x18d   : > { %v1290_v0 = vmax.f32 %v1251_v59, 0.0  ;;  %v3019_v2 = vadd.f32 %v3018_v61, %v3017_v60  ;;  %v3020_v3 = vpop.f32.mrb[42].mxu0  ;;  %v1255_v6 = vpop.f32.mrb[40].mxu1 }
 0x18e   : > { %v3021_v5 = vpop.f32.mrb[43].mxu0  ;;  %v3110_v9 = vpop.f32.mrb[41].mxu1 }
 0x18f   : > { %v1300_v62 = vpack.c.bf16 %v1290_v0, %v1289_v63  ;;  %v3022_v7 = vadd.f32 %v3021_v5, %v3020_v3  ;;  %v1168_v8 = vadd.f32 %v3019_v2, %v4252_v15  ;;  %v1258_v1 = vpop.f32.mrb[42].mxu1  ;;  %v3372_v3 = vld [vmem:[%s4884_s5 + $0x38] sm:$0xff]   ;;  %v3375_v5 = vld [vmem:[%s4886_s7 + $0x4] ss:$28 sps:$4 sm:$0xff]   ;;  %v3385_v9 = vld [vmem:[%s4886_s7 + $0x70] ss:$28 sps:$4 sm:$0xff]  }
 0x190   : > { %v3111_v12 = vpop.f32.mrb[43].mxu1  ;;  %3183 = vmatpush3.bf16.msra.mxu1 %v3372_v3  ;;  %2052 = vmatprep.subr.bf16.mxu0 %v3375_v5 }
 0x191   : > { %v1256_v10 = vadd.f32 %v1255_v6, %v1168_v8  ;;  %v1171_v11 = vadd.f32 %v3022_v7, %v4254_v18  ;;  %3149 = vmatmul.mubr.bf16.gmra.mrb[64].mxu0 %v1300_v62  ;;  %v3378_v6 = vld [vmem:[%s4886_s7 + $0xc] ss:$28 sps:$4 sm:$0xff]   ;;  %v3381_v62 = vld [vmem:[%s4886_s7 + $0x3c] ss:$28 sps:$4 sm:$0xff]   ;;  %v3387_v8 = vld [vmem:[%s4886_s7 + $0x74] ss:$28 sps:$4 sm:$0xff]  }
 0x192   : > { %3152 = vmatprep.mubr.msk.bf16.mxu0 %vm3735_vm0, %v3734_v43  ;;  %2153 = vmatprep.subr.bf16.mxu1 %v3378_v6  ;;  %v3379_v7 = vld [vmem:[%s4886_s7 + $0x38] ss:$28 sps:$4 sm:$0xff]   ;;  %v3397_v12 = vld [vmem:[%s4886_s7 + $0xe0] ss:$28 sps:$4 sm:$0xff]  }
 0x193   : > { %v1259_v14 = vadd.f32 %v1258_v1, %v1171_v11  ;;  %v3023_v16 = vpop.f32.mrb[44].mxu0  ;;  %v1291_v13 = vmax.f32 %v1256_v10, 0.0  ;;  %v3393_v1 = vld [vmem:[%s4886_s7 + $0xac] ss:$28 sps:$4 sm:$0xff]   ;;  %v3399_v11 = vld [vmem:[%s4886_s7 + $0xe4] ss:$28 sps:$4 sm:$0xff]  }
 0x194   : > { %v3024_v17 = vpop.f32.mrb[45].mxu0  ;;  %v3391_v10 = vld [vmem:[%s4886_s7 + $0xa8] ss:$28 sps:$4 sm:$0xff]  }
 0x195   : > { %v1292_v19 = vmax.f32 %v1259_v14, 0.0  ;;  %v3025_v20 = vadd.f32 %v3024_v17, %v3023_v16  ;;  %v3026_v21 = vpop.f32.mrb[46].mxu0  ;;  %v1263_v23 = vpop.f32.mrb[44].mxu1  ;;  %v3405_v14 = vld [vmem:[%s4886_s7 + $0x11c] ss:$28 sps:$4 sm:$0xff]  }
 0x196   : > { %v3027_v22 = vpop.f32.mrb[47].mxu0  ;;  %v3114_v26 = vpop.f32.mrb[45].mxu1  ;;  %v3403_v16 = vld [vmem:[%s4886_s7 + $0x118] ss:$28 sps:$4 sm:$0xff]  }
 0x197   : > { %v1301_v15 = vpack.c.bf16 %v1292_v19, %v1291_v13  ;;  %v3028_v24 = vadd.f32 %v3027_v22, %v3026_v21  ;;  %v1176_v25 = vadd.f32 %v3025_v20, %v4258_v33  ;;  %v1266_v18 = vpop.f32.mrb[46].mxu1  ;;  %v3411_v17 = vld [vmem:[%s4886_s7 + $0x154] ss:$28 sps:$4 sm:$0xff]   ;;  %v4347_v19 = vld [vmem:[%s4883_s4] ss:$0 sm:$0xff] }
 0x198   : > { %v3115_v30 = vpop.f32.mrb[47].mxu1  ;;  %v3409_v13 = vld [vmem:[%s4886_s7 + $0x150] ss:$28 sps:$4 sm:$0xff]  }
 0x199   : > { %v1264_v28 = vadd.f32 %v1263_v23, %v1176_v25  ;;  %v1179_v29 = vadd.f32 %v3028_v24, %v4260_v36  ;;  %3153 = vmatmul.mubr.bf16.gmra.mrb[68].mxu0 %v1301_v15 }
 0x19a   : > { %3156 = vmatprep.mubr.msk.bf16.mxu0 %vm3735_vm0, %v3734_v43 }
 0x19b   : > { %v1267_v32 = vadd.f32 %v1266_v18, %v1179_v29  ;;  %v3029_v34 = vpop.f32.mrb[48].mxu0  ;;  %v1293_v35 = vmax.f32 %v1264_v28, 0.0  ;;  %v3376_v18 = vld [vmem:[%s4886_s7 + $0x8] ss:$28 sps:$4 sm:$0xff]  }
 0x19c   : > { %v3030_v27 = vpop.f32.mrb[49].mxu0  ;;  %v3384_v29 = vld [vmem:[%s4886_s7 + $0x44] ss:$28 sps:$4 sm:$0xff]  }
 0x19d   : > { %v1294_v37 = vmax.f32 %v1267_v32, 0.0  ;;  %v3031_v38 = vadd.f32 %v3030_v27, %v3029_v34  ;;  %v3032_v31 = vpop.f32.mrb[50].mxu0  ;;  %v1271_v40 = vpop.f32.mrb[48].mxu1 }
 0x19e   : > { %v3033_v39 = vpop.f32.mrb[51].mxu0  ;;  %v3118_v44 = vpop.f32.mrb[49].mxu1 }
 0x19f   : > { %v1302_v33 = vpack.c.bf16 %v1294_v37, %v1293_v35  ;;  %v3034_v41 = vadd.f32 %v3033_v39, %v3032_v31  ;;  %v1184_v42 = vadd.f32 %v3031_v38, %v4264_v52  ;;  %v1274_v36 = vpop.f32.mrb[50].mxu1  ;;  %v3382_v35 = vld [vmem:[%s4886_s7 + $0x40] ss:$28 sps:$4 sm:$0xff]  }
 0x1a0   : > { %v3119_v48 = vpop.f32.mrb[51].mxu1  ;;  %v3390_v31 = vld [vmem:[%s4886_s7 + $0x7c] ss:$28 sps:$4 sm:$0xff]  }
 0x1a1   : > { %v1272_v45 = vadd.f32 %v1271_v40, %v1184_v42  ;;  %v1187_v47 = vadd.f32 %v3034_v41, %v4266_v55  ;;  %3157 = vmatmul.mubr.bf16.gmra.mrb[72].mxu0 %v1302_v33  ;;  %v3388_v33 = vld [vmem:[%s4886_s7 + $0x78] ss:$28 sps:$4 sm:$0xff]   ;;  %v3394_v48 = vld [vmem:[%s4886_s7 + $0xb0] ss:$28 sps:$4 sm:$0xff]  }
 0x1a2   : > { %3160 = vmatprep.mubr.msk.bf16.mxu0 %vm3735_vm0, %v3734_v43  ;;  %v3396_v42 = vld [vmem:[%s4886_s7 + $0xb4] ss:$28 sps:$4 sm:$0xff]  }
 0x1a3   : > { %v1275_v50 = vadd.f32 %v1274_v36, %v1187_v47  ;;  %v3035_v46 = vpop.f32.mrb[52].mxu0  ;;  %v1295_v53 = vmax.f32 %v1272_v45, 0.0 }
 0x1a4   : > { %v3036_v51 = vpop.f32.mrb[53].mxu0 }
 0x1a5   : > { %v1296_v54 = vmax.f32 %v1275_v50, 0.0  ;;  %v3037_v49 = vadd.f32 %v3036_v51, %v3035_v46  ;;  %v3038_v56 = vpop.f32.mrb[54].mxu0  ;;  %v1279_v57 = vpop.f32.mrb[52].mxu1  ;;  %v3402_v51 = vld [vmem:[%s4886_s7 + $0xec] ss:$28 sps:$4 sm:$0xff]  }
 0x1a6   : > { %v3039_v58 = vpop.f32.mrb[55].mxu0  ;;  %v3122_v60 = vpop.f32.mrb[53].mxu1 }
 0x1a7   : > { %v1303_v52 = vpack.c.bf16 %v1296_v54, %v1295_v53  ;;  %v1192_v59 = vadd.f32 %v3037_v49, %v4269_v4  ;;  %v1282_v61 = vpop.f32.mrb[54].mxu1  ;;  %v3373_v4 = vld [vmem:[%s4886_s7] ss:$28 sps:$4 sm:$0xff]   ;;  %v3400_v49 = vld [vmem:[%s4886_s7 + $0xe8] ss:$28 sps:$4 sm:$0xff]  }
 0x1a8   : > { %v3123_v63 = vpop.f32.mrb[55].mxu1  ;;  %2053 = vmatpush1.bf16.msra.mxu0 %v3373_v4  ;;  %v3406_v61 = vld [vmem:[%s4886_s7 + $0x120] ss:$28 sps:$4 sm:$0xff]   ;;  %v3412_v4 = vld [vmem:[%s4886_s7 + $0x158] ss:$28 sps:$4 sm:$0xff]  }
 0x1a9   : > { %v1280_v55 = vadd.f32 %v1279_v57, %v1192_v59  ;;  %3161 = vmatmul.mubr.bf16.gmra.mrb[76].mxu0 %v1303_v52  ;;  %2054 = vmatprep.subr.bf16.mxu0 %v3381_v62  ;;  %v3408_v57 = vld [vmem:[%s4886_s7 + $0x124] ss:$28 sps:$4 sm:$0xff]  }
 0x1aa   : > { %3164 = vmatprep.mubr.msk.bf16.mxu0 %vm3735_vm0, %v3734_v43 }
 0x1ab   : > { %v1297_v0 = vmax.f32 %v1280_v55, 0.0 }
 0x1ac   : > { %2055 = vmatpush1.bf16.msra.mxu0 %v3379_v7 }
 0x1ad   : > { %v1304_v2 = vpack.c.bf16 %v1297_v0, %v1297_v0  ;;  %2056 = vmatprep.subr.bf16.mxu0 %v3387_v8  ;;  %v3414_v0 = vld [vmem:[%s4886_s7 + $0x15c] ss:$28 sps:$4 sm:$0xff]  }
 0x1b0   : > { %2057 = vmatpush1.bf16.msra.mxu0 %v3385_v9 }
 0x1b1   : > { %3165 = vmatmul.mubr.bf16.gmra.mrb[80].mxu0 %v1304_v2  ;;  %2058 = vmatprep.subr.bf16.mxu0 %v3393_v1 }
 0x1b4   : > { %2059 = vmatpush1.bf16.msra.mxu0 %v3391_v10 }
 0x1b5   : > { %2060 = vmatprep.subr.bf16.mxu0 %v3399_v11 }
 0x1b8   : > { %2061 = vmatpush1.bf16.msra.mxu0 %v3397_v12 }
 0x1b9   : > { %2062 = vmatprep.subr.bf16.mxu0 %v3405_v14 }
 0x1bc   : > { %2063 = vmatpush1.bf16.msra.mxu0 %v3403_v16 }
 0x1bd   : > { %2064 = vmatprep.subr.bf16.mxu0 %v3411_v17 }
 0x1c0   : > { %2065 = vmatpush1.bf16.msra.mxu0 %v3409_v13 }
 0x254   : > { %v1410_v20 = vpop.f32.mrb[56].mxu0 }
 0x255   : > { %v1411_v21 = vadd.f32 %v4347_v19, %v1410_v20  ;;  %v3142_v22 = vpop.f32.mrb[57].mxu0 }
 0x256   : > { %v1413_v23 = vpop.f32.mrb[58].mxu0 }
 0x257   : > { %v1414_v15 = vadd.f32 %v4347_v19, %v1413_v23  ;;  %v3143_v24 = vpop.f32.mrb[59].mxu0  ;;  %v1464_v25 = vmax.f32 %v1411_v21, 0.0 }
 0x259   : > { %v1465_v26 = vmax.f32 %v1414_v15, 0.0 }
 0x25b   : > { %v1477_v28 = vpack.c.bf16 %v1465_v26, %v1464_v25 }
 0x25c   : > { %v1418_v30 = vpop.f32.mrb[60].mxu0 }
 0x25d   : > { %v1419_v32 = vadd.f32 %v4347_v19, %v1418_v30  ;;  %v3146_v34 = vpop.f32.mrb[61].mxu0  ;;  %3185 = vmatmul.mubr.bf16.vlgmr.msra.gmra.mrb[56].mxu1 %v1477_v28 }
 0x25e   : > { %v1421_v27 = vpop.f32.mrb[62].mxu0  ;;  %3188 = vmatprep.mubr.msk.bf16.mxu1 %vm3735_vm0, %v3734_v43  ;;  %2154 = vmatpush1.bf16.msra.mxu1 %v3376_v18  ;;  %v3420_v34 = vld [vmem:[%s4886_s7 + $0x194] ss:$28 sps:$4 sm:$0xff]  }
 0x25f   : > { %v1422_v37 = vadd.f32 %v4347_v19, %v1421_v27  ;;  %v3147_v38 = vpop.f32.mrb[63].mxu0  ;;  %2155 = vmatprep.subr.bf16.mxu1 %v3384_v29  ;;  %v1466_v39 = vmax.f32 %v1419_v32, 0.0  ;;  %v3417_v32 = vld [vmem:[%s4886_s7 + $0x18c] ss:$28 sps:$4 sm:$0xff]  }
 0x260   : > { %v3418_v27 = vld [vmem:[%s4886_s7 + $0x190] ss:$28 sps:$4 sm:$0xff]   ;;  %2066 = vmatprep.subr.bf16.mxu0 %v3417_v32  ;;  %v4434_v38 = vld [vmem:[%s4885_s6] ss:$0 sm:$0xff] }
 0x261   : > { %v1467_v40 = vmax.f32 %v1422_v37, 0.0  ;;  %v3423_v37 = vld [vmem:[%s4886_s7 + $0x14] ss:$28 sps:$4 sm:$0xff]  }
 0x262   : > { %2156 = vmatpush1.bf16.msra.mxu1 %v3382_v35  ;;  %v3736_v35 = vmov 0  }
 0x263   : > { %v1478_v41 = vpack.c.bf16 %v1467_v40, %v1466_v39  ;;  %2157 = vmatprep.subr.bf16.mxu1 %v3390_v31  ;;  %2084 = vmatprep.mubr.bf16.mxu0 %v3736_v35 }
 0x264   : > { %v1426_v44 = vpop.f32.mrb[64].mxu0 }
 0x265   : > { %v1427_v36 = vadd.f32 %v4347_v19, %v1426_v44  ;;  %v3150_v45 = vpop.f32.mrb[65].mxu0  ;;  %3189 = vmatmul.mubr.bf16.gmra.mrb[60].mxu1 %v1478_v41 }
 0x266   : > { %v1429_v47 = vpop.f32.mrb[66].mxu0  ;;  %3192 = vmatprep.mubr.msk.bf16.mxu1 %vm3735_vm0, %v3734_v43  ;;  %2158 = vmatpush1.bf16.msra.mxu1 %v3388_v33  ;;  %v3421_v45 = vld [vmem:[%s4886_s7 + $0x10] ss:$28 sps:$4 sm:$0xff]  }
 0x267   : > { %v1430_v50 = vadd.f32 %v4347_v19, %v1429_v47  ;;  %v3151_v46 = vpop.f32.mrb[67].mxu0  ;;  %2159 = vmatprep.subr.bf16.mxu1 %v3396_v42  ;;  %v1468_v53 = vmax.f32 %v1427_v36, 0.0  ;;  %v3424_v47 = vld [vmem:[%s4886_s7 + $0x18] ss:$28 sps:$4 sm:$0xff]  }
 0x268   : > { %v3427_v46 = vld [vmem:[%s4886_s7 + $0x4c] ss:$28 sps:$4 sm:$0xff]  }
 0x269   : > { %v1469_v54 = vmax.f32 %v1430_v50, 0.0 }
 0x26a   : > { %2160 = vmatpush1.bf16.msra.mxu1 %v3394_v48 }
 0x26b   : > { %v1479_v56 = vpack.c.bf16 %v1469_v54, %v1468_v53  ;;  %2161 = vmatprep.subr.bf16.mxu1 %v3402_v51 }
 0x26c   : > { %v1434_v58 = vpop.f32.mrb[68].mxu0 }
 0x26d   : > { %v1435_v52 = vadd.f32 %v4347_v19, %v1434_v58  ;;  %v3154_v59 = vpop.f32.mrb[69].mxu0  ;;  %3193 = vmatmul.mubr.bf16.gmra.mrb[64].mxu1 %v1479_v56  ;;  %v3428_v56 = vld [vmem:[%s4886_s7 + $0x50] ss:$28 sps:$4 sm:$0xff]  }
 0x26e   : > { %v1437_v60 = vpop.f32.mrb[70].mxu0  ;;  %3196 = vmatprep.mubr.msk.bf16.mxu1 %vm3735_vm0, %v3734_v43  ;;  %2162 = vmatpush1.bf16.msra.mxu1 %v3400_v49  ;;  %v3425_v49 = vld [vmem:[%s4886_s7 + $0x48] ss:$28 sps:$4 sm:$0xff]  }
 0x26f   : > { %v1438_v55 = vadd.f32 %v4347_v19, %v1437_v60  ;;  %v3155_v63 = vpop.f32.mrb[71].mxu0  ;;  %2163 = vmatprep.subr.bf16.mxu1 %v3408_v57  ;;  %v1470_v2 = vmax.f32 %v1435_v52, 0.0  ;;  %v3431_v52 = vld [vmem:[%s4886_s7 + $0x84] ss:$28 sps:$4 sm:$0xff]  }
 0x270   : > { %v3432_v63 = vld [vmem:[%s4886_s7 + $0x88] ss:$28 sps:$4 sm:$0xff]  }
 0x271   : > { %v1471_v3 = vmax.f32 %v1438_v55, 0.0  ;;  %v3429_v55 = vld [vmem:[%s4886_s7 + $0x80] ss:$28 sps:$4 sm:$0xff]  }
 0x272   : > { %2164 = vmatpush1.bf16.msra.mxu1 %v3406_v61 }
 0x273   : > { %v1480_v5 = vpack.c.bf16 %v1471_v3, %v1470_v2  ;;  %2165 = vmatprep.subr.bf16.mxu1 %v3414_v0  ;;  %v3435_v2 = vld [vmem:[%s4886_s7 + $0xbc] ss:$28 sps:$4 sm:$0xff]  }
 0x274   : > { %v1442_v6 = vpop.f32.mrb[72].mxu0 }
 0x275   : > { %v1443_v62 = vadd.f32 %v4347_v19, %v1442_v6  ;;  %v3158_v7 = vpop.f32.mrb[73].mxu0  ;;  %3197 = vmatmul.mubr.bf16.gmra.mrb[68].mxu1 %v1480_v5 }
 0x276   : > { %v1445_v8 = vpop.f32.mrb[74].mxu0  ;;  %3200 = vmatprep.mubr.msk.bf16.mxu1 %vm3735_vm0, %v3734_v43  ;;  %2166 = vmatpush1.bf16.msra.mxu1 %v3412_v4  ;;  %v3433_v7 = vld [vmem:[%s4886_s7 + $0xb8] ss:$28 sps:$4 sm:$0xff]  }
 0x277   : > { %v1446_v9 = vadd.f32 %v4347_v19, %v1445_v8  ;;  %v3159_v1 = vpop.f32.mrb[75].mxu0  ;;  %v1472_v10 = vmax.f32 %v1443_v62, 0.0  ;;  %2167 = vmatprep.subr.bf16.mxu1 %v3420_v34  ;;  %v3436_v8 = vld [vmem:[%s4886_s7 + $0xc0] ss:$28 sps:$4 sm:$0xff]  }
 0x278   : > { %v3451_v34 = vld [vmem:[%s4886_s7 + $0x19c] ss:$28 sps:$4 sm:$0xff]  }
 0x279   : > { %v1473_v11 = vmax.f32 %v1446_v9, 0.0  ;;  %v3439_v9 = vld [vmem:[%s4886_s7 + $0xf4] ss:$28 sps:$4 sm:$0xff]  }
 0x27a   : > { %2168 = vmatpush1.bf16.msra.mxu1 %v3418_v27 }
 0x27b   : > { %v1481_v12 = vpack.c.bf16 %v1473_v11, %v1472_v10  ;;  %3212 = vmatprep.subr.bf16.mxu1 %v3734_v43 }
 0x27c   : > { %v1450_v14 = vpop.f32.mrb[76].mxu0 }
 0x27d   : > { %v1451_v16 = vadd.f32 %v4347_v19, %v1450_v14  ;;  %v3162_v17 = vpop.f32.mrb[77].mxu0  ;;  %3201 = vmatmul.mubr.bf16.gmra.mrb[72].mxu1 %v1481_v12  ;;  %v3437_v12 = vld [vmem:[%s4886_s7 + $0xf0] ss:$28 sps:$4 sm:$0xff]   ;;  %v3440_v14 = vld [vmem:[%s4886_s7 + $0xf8] ss:$28 sps:$4 sm:$0xff]  }
 0x27e   : > { %v1453_v13 = vpop.f32.mrb[78].mxu0  ;;  %3204 = vmatprep.mubr.msk.bf16.mxu1 %vm3735_vm0, %v3734_v43  ;;  %v3443_v17 = vld [vmem:[%s4886_s7 + $0x12c] ss:$28 sps:$4 sm:$0xff]  }
 0x27f   : > { %v1454_v20 = vadd.f32 %v4347_v19, %v1453_v13  ;;  %v3163_v21 = vpop.f32.mrb[79].mxu0  ;;  %v1474_v22 = vmax.f32 %v1451_v16, 0.0 }
 0x281   : > { %v1475_v23 = vmax.f32 %v1454_v20, 0.0 }
 0x283   : > { %v1482_v15 = vpack.c.bf16 %v1475_v23, %v1474_v22 }
 0x284   : > { %v1458_v24 = vpop.f32.mrb[80].mxu0 }
 0x285   : > { %v1459_v25 = vadd.f32 %v4347_v19, %v1458_v24  ;;  %v3166_v26 = vpop.f32.mrb[81].mxu0  ;;  %3205 = vmatmul.mubr.bf16.gmra.mrb[76].mxu1 %v1482_v15  ;;  %v3415_v19 = vld [vmem:[%s4886_s7 + $0x188] ss:$28 sps:$4 sm:$0xff]   ;;  %v3444_v24 = vld [vmem:[%s4886_s7 + $0x130] ss:$28 sps:$4 sm:$0xff]  }
 0x286   : > { %v1461_v18 = vpop.f32.mrb[82].mxu0  ;;  %3208 = vmatprep.mubr.msk.bf16.mxu1 %vm3735_vm0, %v3734_v43  ;;  %2067 = vmatpush1.bf16.msra.mxu0 %v3415_v19  ;;  %v3441_v15 = vld [vmem:[%s4886_s7 + $0x128] ss:$28 sps:$4 sm:$0xff]  }
 0x287   : > { %v1476_v28 = vmax.f32 %v1459_v25, 0.0  ;;  %v3167_v29 = vpop.f32.mrb[83].mxu0  ;;  %2254 = vmatprep.subr.bf16.mxu0 %v3423_v37  ;;  %v3447_v25 = vld [vmem:[%s4886_s7 + $0x164] ss:$28 sps:$4 sm:$0xff]  }
 0x288   : > { %v3445_v29 = vld [vmem:[%s4886_s7 + $0x160] ss:$28 sps:$4 sm:$0xff]  }
 0x289   : > { %v1483_v30 = vpack.c.bf16 %v1476_v28, %v1476_v28 }
 0x28d   : > { %3209 = vmatmul.mubr.bf16.gmra.mrb[80].mxu1 %v1483_v30  ;;  %v3448_v30 = vld [vmem:[%s4886_s7 + $0x168] ss:$28 sps:$4 sm:$0xff]  }
 0x28e   : > { %2185 = vmatprep.mubr.bf16.mxu1 %v3736_v35 }
 0x330   : > { %v1589_v31 = vpop.f32.mrb[56].mxu1 }
 0x331   : > { %v1590_v39 = vadd.f32 %v4434_v38, %v1589_v31  ;;  %v3186_v40 = vpop.f32.mrb[57].mxu1 }
 0x332   : > { %v1592_v33 = vpop.f32.mrb[58].mxu1  ;;  %v3449_v40 = vld [vmem:[%s4886_s7 + $0x198] ss:$28 sps:$4 sm:$0xff]  }
 0x333   : > { %v1593_v41 = vadd.f32 %v4434_v38, %v1592_v33  ;;  %v3187_v42 = vpop.f32.mrb[59].mxu1  ;;  %v1643_v44 = vmax.f32 %v1590_v39, 0.0  ;;  %v3452_v33 = vld [vmem:[%s4886_s7 + $0x1a0] ss:$28 sps:$4 sm:$0xff]  }
 0x335   : > { %v1644_v36 = vmax.f32 %v1593_v41, 0.0 }
 0x337   : > { %v4444_v48 = vpack.c.bf16 %v1644_v36, %v1643_v44 }
 0x338   : > { %v1597_v50 = vpop.f32.mrb[60].mxu1 }
 0x339   : > { %v1598_v51 = vadd.f32 %v4434_v38, %v1597_v50  ;;  %v3190_v53 = vpop.f32.mrb[61].mxu1  ;;  %2085 = vmatmul.mubr.bf16.vlgmr.msra.gmra.mrb[84].mxu0 %v4444_v48  ;;  %2186 = vmatmul.mubr.bf16.vlgmr.msra.gmra.mrb[84].mxu1 %v4444_v48 }
 0x33a   : > { %v1600_v54 = vpop.f32.mrb[62].mxu1  ;;  %2255 = vmatpush1.bf16.msra.mxu0 %v3421_v45  ;;  %3213 = vmatpush3.bf16.msra.mxu1 %v3424_v47 }
 0x33b   : > { %v1601_v57 = vadd.f32 %v4434_v38, %v1600_v54  ;;  %v3191_v58 = vpop.f32.mrb[63].mxu1  ;;  %2094 = vmatprep.mubr.bf16.mxu0 %v3736_v35  ;;  %2195 = vmatprep.mubr.bf16.mxu1 %v3736_v35  ;;  %v1645_v59 = vmax.f32 %v1598_v51, 0.0 }
 0x33c   : > { %2256 = vmatprep.subr.bf16.mxu0 %v3427_v46  ;;  %3214 = vmatprep.subr.bf16.mxu1 %v3734_v43 }
 0x33d   : > { %v1646_v60 = vmax.f32 %v1601_v57, 0.0 }
 0x33e   : > { %2257 = vmatpush1.bf16.msra.mxu0 %v3425_v49  ;;  %3215 = vmatpush3.bf16.msra.mxu1 %v3428_v56 }
 0x33f   : > { %v4465_v61 = vpack.c.bf16 %v1646_v60, %v1645_v59  ;;  %2258 = vmatprep.subr.bf16.mxu0 %v3431_v52  ;;  %3216 = vmatprep.subr.bf16.mxu1 %v3734_v43 }
 0x340   : > { %v1605_v0 = vpop.f32.mrb[64].mxu1 }
 0x341   : > { %v1606_v3 = vadd.f32 %v4434_v38, %v1605_v0  ;;  %v3194_v4 = vpop.f32.mrb[65].mxu1  ;;  %2095 = vmatmul.mubr.bf16.gmra.mrb[88].mxu0 %v4465_v61  ;;  %2196 = vmatmul.mubr.bf16.gmra.mrb[88].mxu1 %v4465_v61  ;;  %v4589_v0 = vld [vmem:[%s4887_s8] sm:$0x7f] }
 0x342   : > { %v1608_v5 = vpop.f32.mrb[66].mxu1  ;;  %2104 = vmatprep.mubr.bf16.mxu0 %v3736_v35  ;;  %2205 = vmatprep.mubr.bf16.mxu1 %v3736_v35 }
 0x343   : > { %v1609_v6 = vadd.f32 %v4434_v38, %v1608_v5  ;;  %v3195_v62 = vpop.f32.mrb[67].mxu1  ;;  %2259 = vmatpush1.bf16.msra.mxu0 %v3429_v55  ;;  %3217 = vmatpush3.bf16.msra.mxu1 %v3432_v63  ;;  %v1647_v1 = vmax.f32 %v1606_v3, 0.0 }
 0x344   : > { %2260 = vmatprep.subr.bf16.mxu0 %v3435_v2  ;;  %3218 = vmatprep.subr.bf16.mxu1 %v3734_v43 }
 0x345   : > { %v1648_v10 = vmax.f32 %v1609_v6, 0.0 }
 0x347   : > { %v4493_v11 = vpack.c.bf16 %v1648_v10, %v1647_v1  ;;  %2261 = vmatpush1.bf16.msra.mxu0 %v3433_v7  ;;  %3219 = vmatpush3.bf16.msra.mxu1 %v3436_v8 }
 0x348   : > { %v1613_v16 = vpop.f32.mrb[68].mxu1  ;;  %2262 = vmatprep.subr.bf16.mxu0 %v3439_v9  ;;  %3220 = vmatprep.subr.bf16.mxu1 %v3734_v43 }
 0x349   : > { %v1614_v13 = vadd.f32 %v4434_v38, %v1613_v16  ;;  %v3198_v20 = vpop.f32.mrb[69].mxu1  ;;  %2105 = vmatmul.mubr.bf16.gmra.mrb[92].mxu0 %v4493_v11  ;;  %2206 = vmatmul.mubr.bf16.gmra.mrb[92].mxu1 %v4493_v11 }
 0x34a   : > { %v1616_v21 = vpop.f32.mrb[70].mxu1  ;;  %2114 = vmatprep.mubr.bf16.mxu0 %v3736_v35  ;;  %2215 = vmatprep.mubr.bf16.mxu1 %v3736_v35 }
 0x34b   : > { %v1617_v22 = vadd.f32 %v4434_v38, %v1616_v21  ;;  %v3199_v23 = vpop.f32.mrb[71].mxu1  ;;  %2263 = vmatpush1.bf16.msra.mxu0 %v3437_v12  ;;  %3221 = vmatpush3.bf16.msra.mxu1 %v3440_v14  ;;  %v1649_v26 = vmax.f32 %v1614_v13, 0.0 }
 0x34c   : > { %2264 = vmatprep.subr.bf16.mxu0 %v3443_v17  ;;  %3222 = vmatprep.subr.bf16.mxu1 %v3734_v43 }
 0x34d   : > { %v1650_v18 = vmax.f32 %v1617_v22, 0.0 }
 0x34f   : > { %v4521_v28 = vpack.c.bf16 %v1650_v18, %v1649_v26  ;;  %2265 = vmatpush1.bf16.msra.mxu0 %v3441_v15  ;;  %3223 = vmatpush3.bf16.msra.mxu1 %v3444_v24 }
 0x350   : > { %v1621_v32 = vpop.f32.mrb[72].mxu1  ;;  %2266 = vmatprep.subr.bf16.mxu0 %v3447_v25  ;;  %3224 = vmatprep.subr.bf16.mxu1 %v3734_v43 }
 0x351   : > { %v1622_v19 = vadd.f32 %v4434_v38, %v1621_v32  ;;  %v3202_v27 = vpop.f32.mrb[73].mxu1  ;;  %2115 = vmatmul.mubr.bf16.gmra.mrb[96].mxu0 %v4521_v28  ;;  %2216 = vmatmul.mubr.bf16.gmra.mrb[96].mxu1 %v4521_v28 }
 0x352   : > { %v1624_v37 = vpop.f32.mrb[74].mxu1  ;;  %2124 = vmatprep.mubr.bf16.mxu0 %v3736_v35  ;;  %2225 = vmatprep.mubr.bf16.mxu1 %v3736_v35 }
 0x353   : > { %v1625_v31 = vadd.f32 %v4434_v38, %v1624_v37  ;;  %v3203_v39 = vpop.f32.mrb[75].mxu1  ;;  %2267 = vmatpush1.bf16.msra.mxu0 %v3445_v29  ;;  %3225 = vmatpush3.bf16.msra.mxu1 %v3448_v30  ;;  %v1651_v41 = vmax.f32 %v1622_v19, 0.0 }
 0x354   : > { %2268 = vmatprep.subr.bf16.mxu0 %v3451_v34  ;;  %3226 = vmatprep.subr.bf16.mxu1 %v3734_v43 }
 0x355   : > { %v1652_v42 = vmax.f32 %v1625_v31, 0.0 }
 0x357   : > { %v1660_v44 = vpack.c.bf16 %v1652_v42, %v1651_v41  ;;  %2269 = vmatpush1.bf16.msra.mxu0 %v3449_v40  ;;  %3227 = vmatpush3.bf16.msra.mxu1 %v3452_v33 }
 0x358   : > { %v1629_v36 = vpop.f32.mrb[76].mxu1 }
 0x359   : > { %v1630_v45 = vadd.f32 %v4434_v38, %v1629_v36  ;;  %v3206_v47 = vpop.f32.mrb[77].mxu1  ;;  %2125 = vmatmul.mubr.bf16.gmra.mrb[100].mxu0 %v1660_v44  ;;  %2226 = vmatmul.mubr.bf16.gmra.mrb[100].mxu1 %v1660_v44 }
 0x35a   : > { %v1632_v50 = vpop.f32.mrb[78].mxu1  ;;  %2134 = vmatprep.mubr.bf16.mxu0 %v3736_v35  ;;  %2235 = vmatprep.mubr.bf16.mxu1 %v3736_v35 }
 0x35b   : > { %v1633_v46 = vadd.f32 %v4434_v38, %v1632_v50  ;;  %v3207_v51 = vpop.f32.mrb[79].mxu1  ;;  %v1653_v53 = vmax.f32 %v1630_v45, 0.0 }
 0x35d   : > { %v1654_v54 = vmax.f32 %v1633_v46, 0.0 }
 0x35f   : > { %v1661_v49 = vpack.c.bf16 %v1654_v54, %v1653_v53 }
 0x360   : > { %v1637_v56 = vpop.f32.mrb[80].mxu1 }
 0x361   : > { %v1638_v57 = vadd.f32 %v4434_v38, %v1637_v56  ;;  %v3210_v58 = vpop.f32.mrb[81].mxu1  ;;  %2135 = vmatmul.mubr.bf16.gmra.mrb[104].mxu0 %v1661_v49  ;;  %2236 = vmatmul.mubr.bf16.gmra.mrb[104].mxu1 %v1661_v49  ;;  %v1729_v38 = vlaneseq }
 0x362   : > { %v1640_v52 = vpop.f32.mrb[82].mxu1  ;;  %2144 = vmatprep.mubr.bf16.mxu0 %v3736_v35  ;;  %2245 = vmatprep.mubr.bf16.mxu1 %v3736_v35 }
 0x363   : > { %v1655_v59 = vmax.f32 %v1638_v57, 0.0  ;;  %v3211_v60 = vpop.f32.mrb[83].mxu1 }
 0x365   : > { %v1662_v55 = vpack.c.bf16 %v1655_v59, %v1655_v59 }
 0x369   : > { %2145 = vmatmul.mubr.bf16.gmra.mrb[108].mxu0 %v1662_v55  ;;  %2246 = vmatmul.mubr.bf16.gmra.mrb[108].mxu1 %v1662_v55 }
 0x36a   : > { %2286 = vmatprep.mubr.bf16.mxu0 %v3736_v35  ;;  %3228 = vmatprep.mubr.msk.bf16.mxu1 %vm3735_vm0, %v3734_v43 }
 0x371   : > { %2287 = vmatmul.mubr.bf16.vlgmr.msra.gmra.mrb[112].mxu0 %v4444_v48  ;;  %3229 = vmatmul.mubr.bf16.vlgmr.msra.gmra.mrb[112].mxu1 %v4444_v48  ;;  %v4582_v48 = vshrl.u32 %v1729_v38, 7 }
 0x372   : > { %2296 = vmatprep.mubr.bf16.mxu0 %v3736_v35  ;;  %3232 = vmatprep.mubr.msk.bf16.mxu1 %vm3735_vm0, %v3734_v43 }
 0x373   : > { %v1739_v63 = vsub.s32 2, %v4582_v48  ;;  %v1735_v2 = vsub.s32 1, %v4582_v48 }
 0x375   : > { %v4597_v3 = vrot.slane %v4589_v0, %v1739_v63  ;;  %v4600_v4 = vrot.slane %v4589_v0, %v1735_v2 }
 0x379   : > { %2297 = vmatmul.mubr.bf16.gmra.mrb[116].mxu0 %v4465_v61  ;;  %3233 = vmatmul.mubr.bf16.gmra.mrb[116].mxu1 %v4465_v61  ;;  %v1731_v61 = vsub.s32 0, %v4582_v48 }
 0x37a   : > { %2306 = vmatprep.mubr.bf16.mxu0 %v3736_v35  ;;  %3236 = vmatprep.mubr.msk.bf16.mxu1 %vm3735_vm0, %v3734_v43 }
 0x381   : > { %2307 = vmatmul.mubr.bf16.gmra.mrb[120].mxu0 %v4493_v11  ;;  %3237 = vmatmul.mubr.bf16.gmra.mrb[120].mxu1 %v4493_v11 }
 0x382   : > { %2316 = vmatprep.mubr.bf16.mxu0 %v3736_v35  ;;  %3240 = vmatprep.mubr.msk.bf16.mxu1 %vm3735_vm0, %v3734_v43 }
 0x389   : > { %2317 = vmatmul.mubr.bf16.gmra.mrb[124].mxu0 %v4521_v28  ;;  %3241 = vmatmul.mubr.bf16.gmra.mrb[124].mxu1 %v4521_v28 }
 0x38a   : > { %2326 = vmatprep.mubr.bf16.mxu0 %v3736_v35  ;;  %3244 = vmatprep.mubr.msk.bf16.mxu1 %vm3735_vm0, %v3734_v43 }
 0x391   : > { %2327 = vmatmul.mubr.bf16.gmra.mrb[128].mxu0 %v1660_v44  ;;  %3245 = vmatmul.mubr.bf16.gmra.mrb[128].mxu1 %v1660_v44 }
 0x392   : > { %2336 = vmatprep.mubr.bf16.mxu0 %v3736_v35  ;;  %3248 = vmatprep.mubr.msk.bf16.mxu1 %vm3735_vm0, %v3734_v43 }
 0x399   : > { %2337 = vmatmul.mubr.bf16.gmra.mrb[132].mxu0 %v1661_v49  ;;  %3249 = vmatmul.mubr.bf16.gmra.mrb[132].mxu1 %v1661_v49 }
 0x39a   : > { %2346 = vmatprep.mubr.bf16.mxu0 %v3736_v35  ;;  %3252 = vmatprep.mubr.msk.bf16.mxu1 %vm3735_vm0, %v3734_v43  ;;  %v1743_v35 = vsub.s32 3, %v4582_v48  ;;  %v4594_v43 = vrot.slane %v4589_v0, %v1731_v61 }
 0x39c   : > { %v4603_v5 = vrot.slane %v4589_v0, %v1743_v35 }
 0x3a1   : > { %2347 = vmatmul.mubr.bf16.gmra.mrb[136].mxu0 %v1662_v55  ;;  %3253 = vmatmul.mubr.bf16.gmra.mrb[136].mxu1 %v1662_v55 }
 0x40c   : > { %v2086_v6 = vpop.f32.mrb[84].mxu0  ;;  %v2187_v62 = vpop.f32.mrb[84].mxu1 }
 0x40d   : > { %v2087_v7 = vadd.f32 %v2086_v6, %v4594_v43  ;;  %v2188_v8 = vadd.f32 %v2187_v62, %v4597_v3  ;;  %v2088_v9 = vpop.f32.mrb[85].mxu0  ;;  %v2189_v1 = vpop.f32.mrb[85].mxu1 }
 0x40e   : > { %v2089_v10 = vadd.f32 %v2088_v9, %v4600_v4  ;;  %v2190_v11 = vadd.f32 %v2189_v1, %v4603_v5  ;;  %v2090_v12 = vpop.f32.mrb[86].mxu0  ;;  %v2191_v14 = vpop.f32.mrb[86].mxu1 }
 0x40f   : > { %3453 = vtanh.f32 %v2087_v7  ;;  %v2091_v16 = vadd.f32 %v2090_v12, %v4594_v43  ;;  %v2092_v17 = vpop.f32.mrb[87].mxu0  ;;  %v2193_v13 = vpop.f32.mrb[87].mxu1  ;;  %v2192_v20 = vadd.f32 %v2191_v14, %v4597_v3 }
 0x410   : > { %3455 = vtanh.f32 %v2188_v8  ;;  %v2093_v21 = vadd.f32 %v2092_v17, %v4600_v4  ;;  %v2194_v22 = vadd.f32 %v2193_v13, %v4603_v5 }
 0x411   : > { %3457 = vtanh.f32 %v2089_v10 }
 0x412   : > { %3459 = vtanh.f32 %v2190_v11 }
 0x413   : > { %3461 = vtanh.f32 %v2091_v16 }
 0x414   : > { %3463 = vtanh.f32 %v2192_v20  ;;  %v2096_v23 = vpop.f32.mrb[88].mxu0  ;;  %v2197_v15 = vpop.f32.mrb[88].mxu1 }
 0x415   : > { %3465 = vtanh.f32 %v2093_v21  ;;  %v2097_v24 = vadd.f32 %v2096_v23, %v4594_v43  ;;  %v2198_v25 = vadd.f32 %v2197_v15, %v4597_v3  ;;  %v2098_v26 = vpop.f32.mrb[89].mxu0  ;;  %v2199_v18 = vpop.f32.mrb[89].mxu1 }
 0x416   : > { %3467 = vtanh.f32 %v2194_v22  ;;  %v2099_v28 = vadd.f32 %v2098_v26, %v4600_v4  ;;  %v2200_v29 = vadd.f32 %v2199_v18, %v4603_v5  ;;  %v2100_v30 = vpop.f32.mrb[90].mxu0  ;;  %v2201_v32 = vpop.f32.mrb[90].mxu1 }
 0x417   : > { %3469 = vtanh.f32 %v2097_v24  ;;  %v2101_v34 = vadd.f32 %v2100_v30, %v4594_v43  ;;  %v2102_v19 = vpop.f32.mrb[91].mxu0  ;;  %v2203_v27 = vpop.f32.mrb[91].mxu1  ;;  %v2202_v37 = vadd.f32 %v2201_v32, %v4597_v3 }
 0x418   : > { %3471 = vtanh.f32 %v2198_v25  ;;  %v2103_v39 = vadd.f32 %v2102_v19, %v4600_v4  ;;  %v2204_v33 = vadd.f32 %v2203_v27, %v4603_v5 }
 0x419   : > { %v3454_v31 = vpop.eup %3453  ;;  %3473 = vtanh.f32 %v2099_v28 }
 0x41a   : > { %v3456_v40 = vpop.eup %3455  ;;  %2534 = vst [vmem:[%s4622_s11] sm:$0xff] %v3454_v31  ;;  %3475 = vtanh.f32 %v2200_v29 }
 0x41b   : > { %v3458_v41 = vpop.eup %3457  ;;  %2536 = vst [vmem:[%s4622_s11 + $0x10] sm:$0xff] %v3456_v40  ;;  %3477 = vtanh.f32 %v2101_v34 }
 0x41c   : > { %v3460_v42 = vpop.eup %3459  ;;  %2535 = vst [vmem:[%s4622_s11 + $0x8] sm:$0xff] %v3458_v41  ;;  %3479 = vtanh.f32 %v2202_v37  ;;  %v2106_v44 = vpop.f32.mrb[92].mxu0 }
 0x41d   : > { %v2207_v36 = vpop.f32.mrb[92].mxu1  ;;  %v3462_v45 = vpop.eup %3461  ;;  %2537 = vst [vmem:[%s4622_s11 + $0x18] sm:$0xff] %v3460_v42  ;;  %3481 = vtanh.f32 %v2103_v39  ;;  %v2107_v47 = vadd.f32 %v2106_v44, %v4594_v43 }
 0x41e   : > { %v2208_v50 = vadd.f32 %v2207_v36, %v4597_v3  ;;  %v2108_v46 = vpop.f32.mrb[93].mxu0  ;;  %v2209_v51 = vpop.f32.mrb[93].mxu1  ;;  %2541 = vst [vmem:[%s4622_s11 + $0x38] sm:$0xff] %v3462_v45  ;;  %3483 = vtanh.f32 %v2204_v33 }
 0x41f   : > { %v3464_v53 = vpop.eup %3463  ;;  %v2109_v54 = vadd.f32 %v2108_v46, %v4600_v4  ;;  %v2210_v49 = vadd.f32 %v2209_v51, %v4603_v5  ;;  %v2110_v56 = vpop.f32.mrb[94].mxu0  ;;  %3485 = vtanh.f32 %v2107_v47 }
 0x420   : > { %v2211_v57 = vpop.f32.mrb[94].mxu1  ;;  %v3466_v58 = vpop.eup %3465  ;;  %2543 = vst [vmem:[%s4622_s11 + $0x48] sm:$0xff] %v3464_v53  ;;  %v2111_v52 = vadd.f32 %v2110_v56, %v4594_v43  ;;  %3487 = vtanh.f32 %v2208_v50 }
 0x421   : > { %v2112_v59 = vpop.f32.mrb[95].mxu0  ;;  %v2213_v60 = vpop.f32.mrb[95].mxu1  ;;  %2542 = vst [vmem:[%s4622_s11 + $0x40] sm:$0xff] %v3466_v58  ;;  %v2212_v38 = vadd.f32 %v2211_v57, %v4597_v3  ;;  %3489 = vtanh.f32 %v2109_v54 }
 0x422   : > { %v3468_v55 = vpop.eup %3467  ;;  %v2113_v63 = vadd.f32 %v2112_v59, %v4600_v4  ;;  %3491 = vtanh.f32 %v2210_v49  ;;  %v2214_v35 = vadd.f32 %v2213_v60, %v4603_v5 }
 0x423   : > { %v3470_v61 = vpop.eup %3469  ;;  %2544 = vst [vmem:[%s4622_s11 + $0x50] sm:$0xff] %v3468_v55  ;;  %3493 = vtanh.f32 %v2111_v52 }
 0x424   : > { %v3472_v2 = vpop.eup %3471  ;;  %2548 = vst [vmem:[%s4622_s11 + $0x70] sm:$0xff] %v3470_v61  ;;  %3495 = vtanh.f32 %v2212_v38  ;;  %v2116_v7 = vpop.f32.mrb[96].mxu0 }
 0x425   : > { %v3474_v6 = vpop.eup %3473  ;;  %2550 = vst [vmem:[%s4622_s11 + $0x80] sm:$0xff] %v3472_v2  ;;  %v2217_v8 = vpop.f32.mrb[96].mxu1  ;;  %3497 = vtanh.f32 %v2113_v63  ;;  %v2117_v1 = vadd.f32 %v2116_v7, %v4594_v43 }
 0x426   : > { %v3476_v62 = vpop.eup %3475  ;;  %2549 = vst [vmem:[%s4622_s11 + $0x78] sm:$0xff] %v3474_v6  ;;  %v2218_v10 = vadd.f32 %v2217_v8, %v4597_v3  ;;  %v2118_v11 = vpop.f32.mrb[97].mxu0  ;;  %3499 = vtanh.f32 %v2214_v35 }
 0x427   : > { %v3478_v9 = vpop.eup %3477  ;;  %2551 = vst [vmem:[%s4622_s11 + $0x88] sm:$0xff] %v3476_v62  ;;  %v2219_v12 = vpop.f32.mrb[97].mxu1  ;;  %v2119_v16 = vadd.f32 %v2118_v11, %v4600_v4  ;;  %3501 = vtanh.f32 %v2117_v1 }
 0x428   : > { %v3480_v14 = vpop.eup %3479  ;;  %2555 = vst [vmem:[%s4622_s11 + $0xa8] sm:$0xff] %v3478_v9  ;;  %v2220_v17 = vadd.f32 %v2219_v12, %v4603_v5  ;;  %v2120_v13 = vpop.f32.mrb[98].mxu0  ;;  %3503 = vtanh.f32 %v2218_v10 }
 0x429   : > { %v2221_v20 = vpop.f32.mrb[98].mxu1  ;;  %v3482_v21 = vpop.eup %3481  ;;  %2557 = vst [vmem:[%s4622_s11 + $0xb8] sm:$0xff] %v3480_v14  ;;  %v2121_v22 = vadd.f32 %v2120_v13, %v4594_v43  ;;  %3505 = vtanh.f32 %v2119_v16 }
 0x42a   : > { %v2122_v23 = vpop.f32.mrb[99].mxu0  ;;  %v2223_v15 = vpop.f32.mrb[99].mxu1  ;;  %2556 = vst [vmem:[%s4622_s11 + $0xb0] sm:$0xff] %v3482_v21  ;;  %v2222_v25 = vadd.f32 %v2221_v20, %v4597_v3  ;;  %3507 = vtanh.f32 %v2220_v17 }
 0x42b   : > { %v3484_v24 = vpop.eup %3483  ;;  %v2123_v18 = vadd.f32 %v2122_v23, %v4600_v4  ;;  %v2224_v29 = vadd.f32 %v2223_v15, %v4603_v5  ;;  %3509 = vtanh.f32 %v2121_v22 }
 0x42c   : > { %v3486_v26 = vpop.eup %3485  ;;  %2558 = vst [vmem:[%s4622_s11 + $0xc0] sm:$0xff] %v3484_v24  ;;  %3511 = vtanh.f32 %v2222_v25  ;;  %v2126_v34 = vpop.f32.mrb[100].mxu0  ;;  %v1747_v24 = vsub.s32 4, %v4582_v48 }
 0x42d   : > { %v3488_v28 = vpop.eup %3487  ;;  %2562 = vst [vmem:[%s4622_s11 + $0xe0] sm:$0xff] %v3486_v26  ;;  %v2227_v19 = vpop.f32.mrb[100].mxu1  ;;  %3513 = vtanh.f32 %v2123_v18  ;;  %v2127_v37 = vadd.f32 %v2126_v34, %v4594_v43 }
 0x42e   : > { %v3490_v30 = vpop.eup %3489  ;;  %2564 = vst [vmem:[%s4622_s11 + $0xf0] sm:$0xff] %v3488_v28  ;;  %v2228_v31 = vadd.f32 %v2227_v19, %v4597_v3  ;;  %v2128_v39 = vpop.f32.mrb[101].mxu0  ;;  %3515 = vtanh.f32 %v2224_v29 }
 0x42f   : > { %v3492_v32 = vpop.eup %3491  ;;  %2563 = vst [vmem:[%s4622_s11 + $0xe8] sm:$0xff] %v3490_v30  ;;  %v2229_v40 = vpop.f32.mrb[101].mxu1  ;;  %v2129_v41 = vadd.f32 %v2128_v39, %v4600_v4  ;;  %3517 = vtanh.f32 %v2127_v37  ;;  %v1755_v30 = vsub.s32 6, %v4582_v48 }
 0x430   : > { %v3494_v27 = vpop.eup %3493  ;;  %2565 = vst [vmem:[%s4622_s11 + $0xf8] sm:$0xff] %v3492_v32  ;;  %v2230_v42 = vadd.f32 %v2229_v40, %v4603_v5  ;;  %v2130_v44 = vpop.f32.mrb[102].mxu0  ;;  %3519 = vtanh.f32 %v2228_v31 }
 0x431   : > { %v3496_v33 = vpop.eup %3495  ;;  %2569 = vst [vmem:[%s4622_s11 + $0x118] sm:$0xff] %v3494_v27  ;;  %v2231_v36 = vpop.f32.mrb[102].mxu1  ;;  %v2131_v47 = vadd.f32 %v2130_v44, %v4594_v43  ;;  %3521 = vtanh.f32 %v2129_v41 }
 0x432   : > { %v3498_v45 = vpop.eup %3497  ;;  %2571 = vst [vmem:[%s4622_s11 + $0x128] sm:$0xff] %v3496_v33  ;;  %v2132_v50 = vpop.f32.mrb[103].mxu0  ;;  %v2232_v53 = vadd.f32 %v2231_v36, %v4597_v3  ;;  %3523 = vtanh.f32 %v2230_v42 }
 0x433   : > { %v2233_v46 = vpop.f32.mrb[103].mxu1  ;;  %v3500_v51 = vpop.eup %3499  ;;  %2570 = vst [vmem:[%s4622_s11 + $0x120] sm:$0xff] %v3498_v45  ;;  %v2133_v49 = vadd.f32 %v2132_v50, %v4600_v4  ;;  %3525 = vtanh.f32 %v2131_v47 }
 0x434   : > { %v3502_v54 = vpop.eup %3501  ;;  %2572 = vst [vmem:[%s4622_s11 + $0x130] sm:$0xff] %v3500_v51  ;;  %v2234_v57 = vadd.f32 %v2233_v46, %v4603_v5  ;;  %3527 = vtanh.f32 %v2232_v53  ;;  %v2136_v59 = vpop.f32.mrb[104].mxu0 }
 0x435   : > { %v3504_v56 = vpop.eup %3503  ;;  %2576 = vst [vmem:[%s4622_s11 + $0x150] sm:$0xff] %v3502_v54  ;;  %v2237_v60 = vpop.f32.mrb[104].mxu1  ;;  %3529 = vtanh.f32 %v2133_v49  ;;  %v2137_v38 = vadd.f32 %v2136_v59, %v4594_v43 }
 0x436   : > { %v3506_v58 = vpop.eup %3505  ;;  %2578 = vst [vmem:[%s4622_s11 + $0x160] sm:$0xff] %v3504_v56  ;;  %v2238_v61 = vadd.f32 %v2237_v60, %v4597_v3  ;;  %v2138_v63 = vpop.f32.mrb[105].mxu0  ;;  %3531 = vtanh.f32 %v2234_v57 }
 0x437   : > { %v3508_v52 = vpop.eup %3507  ;;  %2577 = vst [vmem:[%s4622_s11 + $0x158] sm:$0xff] %v3506_v58  ;;  %v2239_v2 = vpop.f32.mrb[105].mxu1  ;;  %v2139_v6 = vadd.f32 %v2138_v63, %v4600_v4  ;;  %3533 = vtanh.f32 %v2137_v38 }
 0x438   : > { %v3510_v55 = vpop.eup %3509  ;;  %2579 = vst [vmem:[%s4622_s11 + $0x168] sm:$0xff] %v3508_v52  ;;  %v2240_v62 = vadd.f32 %v2239_v2, %v4603_v5  ;;  %v2140_v7 = vpop.f32.mrb[106].mxu0  ;;  %3535 = vtanh.f32 %v2238_v61 }
 0x439   : > { %v3512_v35 = vpop.eup %3511  ;;  %2583 = vst [vmem:[%s4622_s11 + $0x188] sm:$0xff] %v3510_v55  ;;  %v2241_v8 = vpop.f32.mrb[106].mxu1  ;;  %v2141_v1 = vadd.f32 %v2140_v7, %v4594_v43  ;;  %3537 = vtanh.f32 %v2139_v6 }
 0x43a   : > { %v3514_v9 = vpop.eup %3513  ;;  %2585 = vst [vmem:[%s4622_s11 + $0x198] sm:$0xff] %v3512_v35  ;;  %v2142_v10 = vpop.f32.mrb[107].mxu0  ;;  %v2242_v14 = vadd.f32 %v2241_v8, %v4597_v3  ;;  %3539 = vtanh.f32 %v2240_v62 }
 0x43b   : > { %v2243_v11 = vpop.f32.mrb[107].mxu1  ;;  %v3516_v12 = vpop.eup %3515  ;;  %2584 = vst [vmem:[%s4622_s11 + $0x190] sm:$0xff] %v3514_v9  ;;  %v2143_v17 = vadd.f32 %v2142_v10, %v4600_v4  ;;  %3541 = vtanh.f32 %v2141_v1 }
 0x43c   : > { %v3518_v16 = vpop.eup %3517  ;;  %2586 = vst [vmem:[%s4622_s11 + $0x1a0] sm:$0xff] %v3516_v12  ;;  %v2244_v20 = vadd.f32 %v2243_v11, %v4603_v5  ;;  %3543 = vtanh.f32 %v2242_v14  ;;  %v2146_v23 = vpop.f32.mrb[108].mxu0 }
 0x43d   : > { %v3520_v13 = vpop.eup %3519  ;;  %2590 = vst [vmem:[%s4622_s11 + $0x1c0] sm:$0xff] %v3518_v16  ;;  %v2247_v15 = vpop.f32.mrb[108].mxu1  ;;  %3545 = vtanh.f32 %v2143_v17  ;;  %v2147_v26 = vadd.f32 %v2146_v23, %v4594_v43  ;;  %v1751_v43 = vsub.s32 5, %v4582_v48 }
 0x43e   : > { %v3522_v21 = vpop.eup %3521  ;;  %2592 = vst [vmem:[%s4622_s11 + $0x1d0] sm:$0xff] %v3520_v13  ;;  %v2248_v18 = vadd.f32 %v2247_v15, %v4597_v3  ;;  %v2148_v28 = vpop.f32.mrb[109].mxu0  ;;  %3547 = vtanh.f32 %v2244_v20 }
 0x43f   : > { %v3524_v22 = vpop.eup %3523  ;;  %2591 = vst [vmem:[%s4622_s11 + $0x1c8] sm:$0xff] %v3522_v21  ;;  %v2249_v29 = vpop.f32.mrb[109].mxu1  ;;  %v2149_v34 = vadd.f32 %v2148_v28, %v4600_v4  ;;  %3549 = vtanh.f32 %v2147_v26  ;;  %v4705_v4 = vrot.slane %v4589_v0, %v1747_v24  ;;  %v4712_v41 = vrot.slane %v4589_v0, %v1751_v43 }
 0x440   : > { %v3526_v25 = vpop.eup %3525  ;;  %2593 = vst [vmem:[%s4622_s11 + $0x1d8] sm:$0xff] %v3524_v22  ;;  %v2250_v19 = vadd.f32 %v2249_v29, %v4603_v5  ;;  %v2150_v27 = vpop.f32.mrb[110].mxu0  ;;  %3551 = vtanh.f32 %v2248_v18  ;;  %v4708_v5 = vrot.slane %v4589_v0, %v1755_v30 }
 0x441   : > { %v3528_v32 = vpop.eup %3527  ;;  %2597 = vst [vmem:[%s4622_s11 + $0x1f8] sm:$0xff] %v3526_v25  ;;  %v2251_v37 = vpop.f32.mrb[110].mxu1  ;;  %3553 = vtanh.f32 %v2149_v34 }
 0x442   : > { %v3530_v31 = vpop.eup %3529  ;;  %2599 = vst [vmem:[%s4622_s11 + $0x208] sm:$0xff] %v3528_v32  ;;  %v2151_v3 = vpop.f32.mrb[111].mxu0  ;;  %3555 = vtanh.f32 %v2250_v19 }
 0x443   : > { %v2252_v39 = vpop.f32.mrb[111].mxu1  ;;  %v3532_v40 = vpop.eup %3531  ;;  %2598 = vst [vmem:[%s4622_s11 + $0x200] sm:$0xff] %v3530_v31 }
 0x444   : > { %v3534_v33 = vpop.eup %3533  ;;  %2600 = vst [vmem:[%s4622_s11 + $0x210] sm:$0xff] %v3532_v40  ;;  %v2288_v36 = vpop.f32.mrb[112].mxu0 }
 0x445   : > { %v3536_v48 = vpop.eup %3535  ;;  %2604 = vst [vmem:[%s4622_s11 + $0x230] sm:$0xff] %v3534_v33  ;;  %v2389_v45 = vpop.f32.mrb[112].mxu1  ;;  %v2289_v50 = vadd.f32 %v2288_v36, %v4705_v4 }
 0x446   : > { %v3538_v42 = vpop.eup %3537  ;;  %2606 = vst [vmem:[%s4622_s11 + $0x240] sm:$0xff] %v3536_v48  ;;  %v2390_v46 = vadd.f32 %v2389_v45, %v4708_v5  ;;  %v2290_v51 = vpop.f32.mrb[113].mxu0 }
 0x447   : > { %v3540_v44 = vpop.eup %3539  ;;  %2605 = vst [vmem:[%s4622_s11 + $0x238] sm:$0xff] %v3538_v42  ;;  %v3230_v53 = vpop.f32.mrb[113].mxu1  ;;  %v2291_v0 = vadd.f32 %v2290_v51, %v4712_v41  ;;  %3557 = vtanh.f32 %v2289_v50 }
 0x448   : > { %v3542_v47 = vpop.eup %3541  ;;  %2607 = vst [vmem:[%s4622_s11 + $0x248] sm:$0xff] %v3540_v44  ;;  %v2292_v49 = vpop.f32.mrb[114].mxu0  ;;  %3559 = vtanh.f32 %v2390_v46 }
 0x449   : > { %v3544_v54 = vpop.eup %3543  ;;  %2611 = vst [vmem:[%s4622_s11 + $0x268] sm:$0xff] %v3542_v47  ;;  %v2392_v56 = vpop.f32.mrb[114].mxu1  ;;  %v2293_v58 = vadd.f32 %v2292_v49, %v4705_v4  ;;  %3561 = vtanh.f32 %v2291_v0 }
 0x44a   : > { %v3546_v57 = vpop.eup %3545  ;;  %2613 = vst [vmem:[%s4622_s11 + $0x278] sm:$0xff] %v3544_v54  ;;  %v2393_v52 = vadd.f32 %v2392_v56, %v4708_v5  ;;  %v2294_v59 = vpop.f32.mrb[115].mxu0 }
 0x44b   : > { %v3231_v60 = vpop.f32.mrb[115].mxu1  ;;  %v3548_v55 = vpop.eup %3547  ;;  %2612 = vst [vmem:[%s4622_s11 + $0x270] sm:$0xff] %v3546_v57  ;;  %v2295_v38 = vadd.f32 %v2294_v59, %v4712_v41  ;;  %3563 = vtanh.f32 %v2293_v58 }
 0x44c   : > { %v3550_v61 = vpop.eup %3549  ;;  %2614 = vst [vmem:[%s4622_s11 + $0x280] sm:$0xff] %v3548_v55  ;;  %3565 = vtanh.f32 %v2393_v52  ;;  %v2298_v6 = vpop.f32.mrb[116].mxu0 }
 0x44d   : > { %v3552_v63 = vpop.eup %3551  ;;  %2618 = vst [vmem:[%s4622_s11 + $0x2a0] sm:$0xff] %v3550_v61  ;;  %3567 = vtanh.f32 %v2295_v38  ;;  %v2397_v62 = vpop.f32.mrb[116].mxu1  ;;  %v2299_v7 = vadd.f32 %v2298_v6, %v4705_v4 }
 0x44e   : > { %v3554_v2 = vpop.eup %3553  ;;  %2620 = vst [vmem:[%s4622_s11 + $0x2b0] sm:$0xff] %v3552_v63  ;;  %v2398_v8 = vadd.f32 %v2397_v62, %v4708_v5  ;;  %v2300_v9 = vpop.f32.mrb[117].mxu0 }
 0x44f   : > { %v3556_v35 = vpop.eup %3555  ;;  %2619 = vst [vmem:[%s4622_s11 + $0x2a8] sm:$0xff] %v3554_v2  ;;  %v3234_v1 = vpop.f32.mrb[117].mxu1  ;;  %v2301_v10 = vadd.f32 %v2300_v9, %v4712_v41  ;;  %3569 = vtanh.f32 %v2299_v7 }
 0x450   : > { %2621 = vst [vmem:[%s4622_s11 + $0x2b8] sm:$0xff] %v3556_v35  ;;  %v2302_v11 = vpop.f32.mrb[118].mxu0  ;;  %v2400_v12 = vpop.f32.mrb[118].mxu1  ;;  %3571 = vtanh.f32 %v2398_v8 }
 0x451   : > { %v2303_v14 = vadd.f32 %v2302_v11, %v4705_v4  ;;  %v2401_v16 = vadd.f32 %v2400_v12, %v4708_v5  ;;  %v2304_v17 = vpop.f32.mrb[119].mxu0  ;;  %v3235_v13 = vpop.f32.mrb[119].mxu1  ;;  %3573 = vtanh.f32 %v2301_v10 }
 0x452   : > { %v2305_v20 = vadd.f32 %v2304_v17, %v4712_v41  ;;  %v3558_v21 = vpop.eup %3557 }
 0x453   : > { %v3560_v22 = vpop.eup %3559  ;;  %2538 = vst [vmem:[%s4622_s11 + $0x20] sm:$0xff] %v3558_v21  ;;  %3575 = vtanh.f32 %v2303_v14 }
 0x454   : > { %v3562_v23 = vpop.eup %3561  ;;  %2540 = vst.msk [vmem:[%s4622_s11 + $0x30] sm:$0xff] %vm911_vm1, %v3560_v22  ;;  %3577 = vtanh.f32 %v2401_v16  ;;  %v2308_v24 = vpop.f32.mrb[120].mxu0 }
 0x455   : > { %v3564_v15 = vpop.eup %3563  ;;  %2539 = vst [vmem:[%s4622_s11 + $0x28] sm:$0xff] %v3562_v23  ;;  %3579 = vtanh.f32 %v2305_v20  ;;  %v2405_v25 = vpop.f32.mrb[120].mxu1  ;;  %v2309_v18 = vadd.f32 %v2308_v24, %v4705_v4 }
 0x456   : > { %v3566_v26 = vpop.eup %3565  ;;  %2545 = vst [vmem:[%s4622_s11 + $0x58] sm:$0xff] %v3564_v15  ;;  %v2406_v28 = vadd.f32 %v2405_v25, %v4708_v5  ;;  %v2310_v29 = vpop.f32.mrb[121].mxu0 }
 0x457   : > { %v3238_v30 = vpop.f32.mrb[121].mxu1  ;;  %v3568_v32 = vpop.eup %3567  ;;  %2547 = vst.msk [vmem:[%s4622_s11 + $0x68] sm:$0xff] %vm911_vm1, %v3566_v26  ;;  %v2311_v34 = vadd.f32 %v2310_v29, %v4712_v41  ;;  %3581 = vtanh.f32 %v2309_v18 }
 0x458   : > { %v2312_v19 = vpop.f32.mrb[122].mxu0  ;;  %v2408_v27 = vpop.f32.mrb[122].mxu1  ;;  %2546 = vst [vmem:[%s4622_s11 + $0x60] sm:$0xff] %v3568_v32  ;;  %3583 = vtanh.f32 %v2406_v28 }
 0x459   : > { %v2313_v37 = vadd.f32 %v2312_v19, %v4705_v4  ;;  %v2409_v43 = vadd.f32 %v2408_v27, %v4708_v5  ;;  %v2314_v31 = vpop.f32.mrb[123].mxu0  ;;  %v3239_v3 = vpop.f32.mrb[123].mxu1  ;;  %3585 = vtanh.f32 %v2311_v34 }
 0x45a   : > { %v2315_v39 = vadd.f32 %v2314_v31, %v4712_v41  ;;  %v3570_v40 = vpop.eup %3569 }
 0x45b   : > { %v3572_v33 = vpop.eup %3571  ;;  %2552 = vst [vmem:[%s4622_s11 + $0x90] sm:$0xff] %v3570_v40  ;;  %3587 = vtanh.f32 %v2313_v37 }
 0x45c   : > { %v3574_v48 = vpop.eup %3573  ;;  %2554 = vst.msk [vmem:[%s4622_s11 + $0xa0] sm:$0xff] %vm911_vm1, %v3572_v33  ;;  %3589 = vtanh.f32 %v2409_v43  ;;  %v2318_v44 = vpop.f32.mrb[124].mxu0 }
 0x45d   : > { %v3576_v42 = vpop.eup %3575  ;;  %2553 = vst [vmem:[%s4622_s11 + $0x98] sm:$0xff] %v3574_v48  ;;  %3591 = vtanh.f32 %v2315_v39  ;;  %v2413_v36 = vpop.f32.mrb[124].mxu1  ;;  %v2319_v47 = vadd.f32 %v2318_v44, %v4705_v4 }
 0x45e   : > { %v3578_v45 = vpop.eup %3577  ;;  %2559 = vst [vmem:[%s4622_s11 + $0xc8] sm:$0xff] %v3576_v42  ;;  %v2414_v50 = vadd.f32 %v2413_v36, %v4708_v5  ;;  %v2320_v46 = vpop.f32.mrb[125].mxu0 }
 0x45f   : > { %v3242_v51 = vpop.f32.mrb[125].mxu1  ;;  %v3580_v53 = vpop.eup %3579  ;;  %2561 = vst.msk [vmem:[%s4622_s11 + $0xd8] sm:$0xff] %vm911_vm1, %v3578_v45  ;;  %v2321_v54 = vadd.f32 %v2320_v46, %v4712_v41  ;;  %3593 = vtanh.f32 %v2319_v47 }
 0x460   : > { %v2322_v0 = vpop.f32.mrb[126].mxu0  ;;  %v2416_v49 = vpop.f32.mrb[126].mxu1  ;;  %2560 = vst [vmem:[%s4622_s11 + $0xd0] sm:$0xff] %v3580_v53  ;;  %3595 = vtanh.f32 %v2414_v50 }
 0x461   : > { %v2323_v56 = vadd.f32 %v2322_v0, %v4705_v4  ;;  %v2417_v57 = vadd.f32 %v2416_v49, %v4708_v5  ;;  %v2324_v58 = vpop.f32.mrb[127].mxu0  ;;  %v3243_v52 = vpop.f32.mrb[127].mxu1  ;;  %3597 = vtanh.f32 %v2321_v54 }
 0x462   : > { %v2325_v59 = vadd.f32 %v2324_v58, %v4712_v41  ;;  %v3582_v60 = vpop.eup %3581 }
 0x463   : > { %v3584_v55 = vpop.eup %3583  ;;  %2566 = vst [vmem:[%s4622_s11 + $0x100] sm:$0xff] %v3582_v60  ;;  %3599 = vtanh.f32 %v2323_v56 }
 0x464   : > { %v3586_v38 = vpop.eup %3585  ;;  %2568 = vst.msk [vmem:[%s4622_s11 + $0x110] sm:$0xff] %vm911_vm1, %v3584_v55  ;;  %3601 = vtanh.f32 %v2417_v57  ;;  %v2328_v63 = vpop.f32.mrb[128].mxu0 }
 0x465   : > { %v3588_v61 = vpop.eup %3587  ;;  %2567 = vst [vmem:[%s4622_s11 + $0x108] sm:$0xff] %v3586_v38  ;;  %3603 = vtanh.f32 %v2325_v59  ;;  %v2421_v2 = vpop.f32.mrb[128].mxu1  ;;  %v2329_v6 = vadd.f32 %v2328_v63, %v4705_v4 }
 0x466   : > { %v3590_v35 = vpop.eup %3589  ;;  %2573 = vst [vmem:[%s4622_s11 + $0x138] sm:$0xff] %v3588_v61  ;;  %v2422_v62 = vadd.f32 %v2421_v2, %v4708_v5  ;;  %v2330_v7 = vpop.f32.mrb[129].mxu0 }
 0x467   : > { %v3246_v8 = vpop.f32.mrb[129].mxu1  ;;  %v3592_v9 = vpop.eup %3591  ;;  %2575 = vst.msk [vmem:[%s4622_s11 + $0x148] sm:$0xff] %vm911_vm1, %v3590_v35  ;;  %v2331_v1 = vadd.f32 %v2330_v7, %v4712_v41  ;;  %3605 = vtanh.f32 %v2329_v6 }
 0x468   : > { %v2332_v10 = vpop.f32.mrb[130].mxu0  ;;  %v2424_v11 = vpop.f32.mrb[130].mxu1  ;;  %2574 = vst [vmem:[%s4622_s11 + $0x140] sm:$0xff] %v3592_v9  ;;  %3607 = vtanh.f32 %v2422_v62 }
 0x469   : > { %v2333_v12 = vadd.f32 %v2332_v10, %v4705_v4  ;;  %v2425_v14 = vadd.f32 %v2424_v11, %v4708_v5  ;;  %v2334_v16 = vpop.f32.mrb[131].mxu0  ;;  %v3247_v17 = vpop.f32.mrb[131].mxu1  ;;  %3609 = vtanh.f32 %v2331_v1 }
 0x46a   : > { %v2335_v13 = vadd.f32 %v2334_v16, %v4712_v41  ;;  %v3594_v20 = vpop.eup %3593 }
 0x46b   : > { %v3596_v21 = vpop.eup %3595  ;;  %2580 = vst [vmem:[%s4622_s11 + $0x170] sm:$0xff] %v3594_v20  ;;  %3611 = vtanh.f32 %v2333_v12 }
 0x46c   : > { %v3598_v22 = vpop.eup %3597  ;;  %2582 = vst.msk [vmem:[%s4622_s11 + $0x180] sm:$0xff] %vm911_vm1, %v3596_v21  ;;  %3613 = vtanh.f32 %v2425_v14  ;;  %v2338_v15 = vpop.f32.mrb[132].mxu0 }
 0x46d   : > { %v3600_v23 = vpop.eup %3599  ;;  %2581 = vst [vmem:[%s4622_s11 + $0x178] sm:$0xff] %v3598_v22  ;;  %3615 = vtanh.f32 %v2335_v13  ;;  %v2429_v24 = vpop.f32.mrb[132].mxu1  ;;  %v2339_v26 = vadd.f32 %v2338_v15, %v4705_v4 }
 0x46e   : > { %v3602_v25 = vpop.eup %3601  ;;  %2587 = vst [vmem:[%s4622_s11 + $0x1a8] sm:$0xff] %v3600_v23  ;;  %v2430_v18 = vadd.f32 %v2429_v24, %v4708_v5  ;;  %v2340_v28 = vpop.f32.mrb[133].mxu0 }
 0x46f   : > { %v3250_v29 = vpop.f32.mrb[133].mxu1  ;;  %v3604_v30 = vpop.eup %3603  ;;  %2589 = vst.msk [vmem:[%s4622_s11 + $0x1b8] sm:$0xff] %vm911_vm1, %v3602_v25  ;;  %v2341_v32 = vadd.f32 %v2340_v28, %v4712_v41  ;;  %3617 = vtanh.f32 %v2339_v26 }
 0x470   : > { %v2342_v34 = vpop.f32.mrb[134].mxu0  ;;  %v2432_v19 = vpop.f32.mrb[134].mxu1  ;;  %2588 = vst [vmem:[%s4622_s11 + $0x1b0] sm:$0xff] %v3604_v30  ;;  %3619 = vtanh.f32 %v2430_v18 }
 0x471   : > { %v2343_v27 = vadd.f32 %v2342_v34, %v4705_v4  ;;  %v2433_v37 = vadd.f32 %v2432_v19, %v4708_v5  ;;  %v2344_v43 = vpop.f32.mrb[135].mxu0  ;;  %v3251_v31 = vpop.f32.mrb[135].mxu1  ;;  %3621 = vtanh.f32 %v2341_v32 }
 0x472   : > { %v2345_v3 = vadd.f32 %v2344_v43, %v4712_v41  ;;  %v3606_v39 = vpop.eup %3605 }
 0x473   : > { %v3608_v40 = vpop.eup %3607  ;;  %2594 = vst [vmem:[%s4622_s11 + $0x1e0] sm:$0xff] %v3606_v39  ;;  %3623 = vtanh.f32 %v2343_v27 }
 0x474   : > { %v3610_v33 = vpop.eup %3609  ;;  %2596 = vst.msk [vmem:[%s4622_s11 + $0x1f0] sm:$0xff] %vm911_vm1, %v3608_v40  ;;  %3625 = vtanh.f32 %v2433_v37  ;;  %v2348_v42 = vpop.f32.mrb[136].mxu0 }
 0x475   : > { %v3612_v48 = vpop.eup %3611  ;;  %2595 = vst [vmem:[%s4622_s11 + $0x1e8] sm:$0xff] %v3610_v33  ;;  %3627 = vtanh.f32 %v2345_v3  ;;  %v2437_v44 = vpop.f32.mrb[136].mxu1  ;;  %v2349_v45 = vadd.f32 %v2348_v42, %v4705_v4 }
 0x476   : > { %v3614_v36 = vpop.eup %3613  ;;  %2601 = vst [vmem:[%s4622_s11 + $0x218] sm:$0xff] %v3612_v48  ;;  %v2438_v47 = vadd.f32 %v2437_v44, %v4708_v5  ;;  %v2350_v50 = vpop.f32.mrb[137].mxu0 }
 0x477   : > { %v3254_v46 = vpop.f32.mrb[137].mxu1  ;;  %v3616_v51 = vpop.eup %3615  ;;  %2603 = vst.msk [vmem:[%s4622_s11 + $0x228] sm:$0xff] %vm911_vm1, %v3614_v36  ;;  %v2351_v53 = vadd.f32 %v2350_v50, %v4712_v41  ;;  %3629 = vtanh.f32 %v2349_v45 }
 0x478   : > { %v2352_v54 = vpop.f32.mrb[138].mxu0  ;;  %v2440_v0 = vpop.f32.mrb[138].mxu1  ;;  %2602 = vst [vmem:[%s4622_s11 + $0x220] sm:$0xff] %v3616_v51  ;;  %3631 = vtanh.f32 %v2438_v47 }
 0x479   : > { %v2353_v4 = vpop.f32.mrb[139].mxu0  ;;  %v3255_v49 = vpop.f32.mrb[139].mxu1  ;;  %3633 = vtanh.f32 %v2351_v53 }
 0x47a   : > { %v3618_v5 = vpop.eup %3617 }
 0x47b   : > { %v3620_v56 = vpop.eup %3619  ;;  %2608 = vst [vmem:[%s4622_s11 + $0x250] sm:$0xff] %v3618_v5 }
 0x47c   : > { %v3622_v57 = vpop.eup %3621  ;;  %2610 = vst.msk [vmem:[%s4622_s11 + $0x260] sm:$0xff] %vm911_vm1, %v3620_v56 }
 0x47d   : > { %v3624_v41 = vpop.eup %3623  ;;  %2609 = vst [vmem:[%s4622_s11 + $0x258] sm:$0xff] %v3622_v57 }
 0x47e   : > { %v3626_v58 = vpop.eup %3625  ;;  %2615 = vst [vmem:[%s4622_s11 + $0x288] sm:$0xff] %v3624_v41  ;;  %2632 = sbr.rel (!%p3834_p9) target bundleno = 1186 (0x4a2), region = 64 }
 0x47f   : > { %v3628_v52 = vpop.eup %3627  ;;  %2617 = vst.msk [vmem:[%s4622_s11 + $0x298] sm:$0xff] %vm911_vm1, %v3626_v58 }
 0x480   : > { %2616 = vst [vmem:[%s4622_s11 + $0x290] sm:$0xff] %v3628_v52 }
 0x481   : > { %v3630_v59 = vpop.eup %3629 }
 0x482   : > { %v3632_v60 = vpop.eup %3631  ;;  %2622 = vst [vmem:[%s4622_s11 + $0x2c0] sm:$0xff] %v3630_v59 }
 0x483   : > { %v3634_v55 = vpop.eup %3633  ;;  %2624 = vst.msk [vmem:[%s4622_s11 + $0x2d0] sm:$0xff] %vm911_vm1, %v3632_v60 }
 0x484   : > { %2623 = vst [vmem:[%s4622_s11 + $0x2c8] sm:$0xff] %v3634_v55 }
 0x485   : > { %s4906_s19 = smov (!%p2635_p6, %s2634_s19), 13 }
 0x486   : > { %s4820_s24 = smul.u32 896, %s4906_s19 }
 0x488   : > { %s2640_s29 = ssub.s32 11648, %s4820_s24 }
 0x489   : > { %2641 = vsyncadd %s2626_s27, %s2640_s29  ;;  %p2862_p10 = scmp.ne.s32.totalorder %s4820_s24, 0  ;;  %s3267_s20 = smul.u32 11648, %s3811_s13 }
 0x48a   : > { %s2647_s18 = sshll.u32 %s4622_s11, 4  ;;  %s3737_s17 = smov [#allocation5]   ;;  %s4833_s18 = int_to_ptr.vmem [resolvable:$true] %s2647_s18 }
 0x48b   : > { %s4831_s14 = scalar_lea.hbm %s4888_s9, %s3267_s20  ;;  %s3663_s16 = scalar_lea.vmem %s4833_s18, %s4820_s24 }
 0x48c   : > { %p3664_p9 = scmp.ne.s32.totalorder %s4833_s18, %s3663_s16  ;;  %s3667_s23 = sshll.u32 %s3737_s17, 4  ;;  %s3668_s23 = int_to_ptr.vmem [resolvable:$false] %s3667_s23 }
 0x48d   : > { %s3669_s13 = scalar_lea.vmem %s3668_s23, 23296  ;;  %p3670_p12 = scmp.lt.s32.totalorder %s4833_s18, %s3668_s23 }
 0x48e   : > { %p3665_p11 = pnand %p3664_p9, %p2862_p10  ;;  %p3671_p0 = scmp.lt.s32.totalorder %s3669_s13, %s3663_s16 }
 0x490   : > { %p3666_p13 = pneg %p3665_p11  ;;  %p3672_p1 = por %p3671_p0, %p3670_p12 }
 0x492   : > { %p3673_p3 = pnand %p3672_p1, %p3666_p13 }
 0x494   : > { %3676 = shalt.err (!%p3673_p3)
}
 0x495   : > { %s3677_s11 = scalar_lea.hbm %s4831_s14, %s4820_s24  ;;  %s3681_s29 = scalar_lea.hbm %s4888_s9, 22400 }
 0x496   : > { %p3678_p4 = scmp.ne.s32.totalorder %s4831_s14, %s3677_s11  ;;  %p3682_p7 = scmp.lt.u32.totalorder %s4831_s14, %s4888_s9 }
 0x497   : > { %p3683_p8 = scmp.lt.u32.totalorder %s3681_s29, %s3677_s11  ;;  %p3685_p9 = scmp.lt.u32.totalorder %s3677_s11, %s4831_s14 }
 0x498   : > { %p3679_p5 = pnand %p3678_p4, %p2862_p10 }
 0x499   : > { %p3684_p6 = por %p3683_p8, %p3682_p7 }
 0x49a   : > { %p3680_p2 = pneg %p3679_p5 }
 0x49b   : > { %p3686_p11 = por %p3685_p9, %p3684_p6 }
 0x49d   : > { %p3687_p13 = pnand %p3686_p11, %p3680_p2 }
 0x49f   : > { %3690 = shalt.err (!%p3687_p13)
}
 0x4a0   : > { %s3738_s28 = smov 896   ;;  %s3739_s16 = smov 56  }
 0x4a1   : > { %2653 = dma.vmem_to_hbm [thread:$0]  (%p2862_p10), %s4833_s18, %s4820_s24, %s4831_s14, %s2626_s27, %s3738_s28, %s3738_s28, %s3739_s16  }
 0x4a2 PF: > { %s2662_s17 = sand.u32 1, %s3717_s30   ;;  %p4896_p12 = scmp.ne.s32.totalorder %s4895_s21, 0 }
 0x4a3   : > { %p4897_p0 = scmp.ge.s32.totalorder %s3729_s12, 2  ;;  %s2663_s23 = scalar_lea.sflag [#allocation4], %s2662_s17 }
 0x4a5   : > { %p3263_p1 = pnand %p4897_p0, %p4896_p12 }
 0x4a7   : > { %3712 = dma.done.wait (!%p3263_p1), %s2663_s23, 11648  }
 0x4a8   : > { %3714 = vsyncadd (!%p3263_p1), %s2663_s23, 4294955648  ;;  %s4898_s13 = sld [smem:[#allocation8_spill]]  ;;  %s4899_s11 = sld [smem:[#allocation9_spill]] }
 0x4a9   : > { %p22_p3 = scmp.ge.s32.totalorder %s3815_s15, 4   ;;  %s4900_s30 = smov %s3721_s10 }
 0x4aa   : > { %s4902_s12 = smov %s3815_s15 }
 0x4ab   :  { %24 = sbr.rel (!%p22_p3) target bundleno = 5 (0x5), region = 101 }
 0x4ae   : > { %s4901_s10 = smov %s4898_s13 }
 0x4b2   :  { %2668 = vsyncpa [#allocation3], 1 }
 0x4b3   :  { %2670 = vsyncpa [#allocation3 + $0x1], 1 }
 0x4b4   :  { %2671 = vsyncpa [#allocation4], 1 }
 0x4b5   :  { %2673 = vsyncpa [#allocation4 + $0x1], 1 }

</bundles_post_ra>
